<compile_context>
chip_gen: v7x
topology: tpu7x:2x2x1
jax: 0.10.0
libtpu: 0.0.40
codegen_flags: <defaults>
</compile_context>

<pallas_src>
import functools

import jax
import jax.numpy as jnp
from jax import lax
from jax.experimental import pallas as pl
from jax.experimental.pallas import tpu as pltpu

_LANE = 128


def _round_up(n, m):
    return ((n + m - 1) // m) * m


def _make_mlp_kernel(num_hidden_layers, inner, num_chunks):
    """Fused MLP body. Activations are feature-major: (features, chunk) with batch on lanes."""

    def kernel(*refs):
        x_ref, *wb_refs, o_ref = refs

        # Weight/bias loads hoisted out of the chunk loop (VMEM-resident, tiny).
        ws = [wb_refs[2 * l][...] for l in range(num_hidden_layers)]       # bf16 (H_out, H_in)
        bs = [wb_refs[2 * l + 1][...] for l in range(num_hidden_layers)]   # f32  (H_out, 1)
        w_out = wb_refs[-2][...]                                           # f32  (H_last, 1)
        b_out = wb_refs[-1][...]                                           # f32  (1, 1)

        def chunk_body(c, carry):
            start = pl.multiple_of(c * inner, _LANE)
            # x chunk in its native batch-major layout; bf16 cast on the VPU (nearly free).
            xb = x_ref[pl.ds(start, inner), :].astype(jnp.bfloat16)        # (inner, F)
            # Layer 1 as an NT matmul (contract the feature axis of BOTH operands): the
            # batch->lane transpose is absorbed into the MXU op; result is feature-major
            # (H1, inner) with the batch riding the 128 lanes.
            h = lax.dot_general(ws[0], xb, (((1,), (1,)), ((), ())),
                                preferred_element_type=jnp.float32)        # (H1, inner) f32
            # Dropout: eval-mode identity (see TODO at top of file).
            h = jnp.maximum(h + bs[0], 0.0)                                # bias + ReLU (VPU)
            for l in range(1, num_hidden_layers):
                h = jnp.dot(ws[l], h.astype(jnp.bfloat16),
                            preferred_element_type=jnp.float32)            # (H_l, inner) f32
                h = jnp.maximum(h + bs[l], 0.0)
            # Output layer (n_output == 1): keep it OFF the MXU — VPU multiply + cross-sublane
            # (XLU) reduce yields the lane-dense (1, inner) row directly.
            z = jnp.sum(h * w_out, axis=0, keepdims=True) + b_out          # (1, inner) f32
            # Exact sigmoid: exp on the (otherwise idle) EUP, exact divide.
            o_ref[:, pl.ds(start, inner)] = (1.0 / (1.0 + jnp.exp(-z))).astype(o_ref.dtype)
            return carry

        lax.fori_loop(0, num_chunks, chunk_body, 0, unroll=True)

    return kernel


def individual_net_forward(x, params, *, batch_tile=2048, inner_chunk=512):
    """Fused MLP forward.

    x: (B, n_feature) float32, streamed as-is (no wrapper-side pad/transpose/cast passes).
    params: list of (w, b) in torch layout — w: (out, in), b: (out,); the last entry is
            the output layer with out == 1.
    Returns (B, 1) float32.
    """
    *hidden, (w_out, b_out) = params
    assert w_out.shape[0] == 1, "kernel assumes n_output == 1"
    B, F = x.shape
    H_last = hidden[-1][0].shape[0]

    # Tile selection: large enough to amortize the ~0.35us per-grid-step overhead, capped
    # so the grid keeps >= 2 steps whenever B allows it (v7x megacore), rounded to the
    # lane width (and to the inner chunk once larger than one chunk).
    tile = max(_LANE, min(_round_up(batch_tile, _LANE), _round_up(pl.cdiv(B, 2), _LANE)))
    if tile > inner_chunk:
        tile = _round_up(tile, inner_chunk)
        inner = inner_chunk
    else:
        inner = tile
    num_chunks = tile // inner
    grid = (pl.cdiv(B, tile),)   # ragged last block is masked by Pallas

    def resident(shape):
        # Constant index_map -> stays resident in VMEM across all grid steps.
        return pl.BlockSpec(shape, lambda i: (0, 0),
                            memory_space=pltpu.MemorySpace.VMEM)

    args = [x]
    in_specs = [pl.BlockSpec((tile, F), lambda i: (i, 0))]      # streamed x tile (batch-major)
    for (w, b) in hidden:
        h_out, h_in = w.shape
        args.append(w.astype(jnp.bfloat16))                     # (out, in), torch layout
        args.append(b.reshape(h_out, 1).astype(jnp.float32))
        in_specs.append(resident((h_out, h_in)))
        in_specs.append(resident((h_out, 1)))
    args.append(w_out.reshape(H_last, 1).astype(jnp.float32))   # column for the VPU/XLU path
    args.append(b_out.reshape(1, 1).astype(jnp.float32))
    in_specs.append(resident((H_last, 1)))
    in_specs.append(resident((1, 1)))

    out = pl.pallas_call(
        _make_mlp_kernel(len(hidden), inner, num_chunks),
        out_shape=jax.ShapeDtypeStruct((1, B), jnp.float32),
        grid_spec=pltpu.PrefetchScalarGridSpec(
            num_scalar_prefetch=0,
            grid=grid,
            in_specs=in_specs,
            # Lane-dense output: (1, tile) blocks of the (1, B) row.
            out_specs=pl.BlockSpec((1, tile), lambda i: (0, i)),
        ),
        compiler_params=pltpu.CompilerParams(
            dimension_semantics=("parallel",)),   # batch axis shards across TCs (v7x)
    )(*args)

    return out.reshape(B, 1)


def _init_linear(key, fan_in, fan_out):
    # Mimics torch.nn.Linear default init: U(-1/sqrt(fan_in), 1/sqrt(fan_in)).
    kw, kb = jax.random.split(key)
    bound = 1.0 / jnp.sqrt(jnp.float32(fan_in))
    w = jax.random.uniform(kw, (fan_out, fan_in), jnp.float32, -bound, bound)  # torch (out, in)
    b = jax.random.uniform(kb, (fan_out,), jnp.float32, -bound, bound)
    return w, b


def _reference_forward(x, params):
    # Pure-JAX reference mirroring the kernel's numerics: bf16-rounded operands for the
    # hidden matmuls, f32 accumulation, full-f32 output layer, exact sigmoid.
    *hidden, (w_out, b_out) = params
    hp = jax.lax.Precision.HIGHEST
    h = x
    for (w, b) in hidden:
        hb = h.astype(jnp.bfloat16).astype(jnp.float32)
        wb = w.astype(jnp.bfloat16).astype(jnp.float32)
        h = jnp.maximum(jnp.dot(hb, wb.T, precision=hp) + b, 0.0)
    z = jnp.dot(h, w_out.T, precision=hp) + b_out
    return jax.nn.sigmoid(z)


if __name__ == "__main__":
    # IndividualNet(n_feature=32, n_hidden=[64, 32], n_output=1)
    n_feature, n_hidden, n_output = 32, [64, 32], 1
    # batch=1500 -> tile=1024 (two 512-lane inner chunks), grid of 2 (exercises megacore
    # sharding, the inner chunk loop, and the ragged last block — no padding needed).
    batch = 1500

    key = jax.random.PRNGKey(0)
    kx, *wkeys = jax.random.split(key, 2 + len(n_hidden))

    x = jax.random.normal(kx, (batch, n_feature), jnp.float32)
    dims = [n_feature, *n_hidden, n_output]
    params = [_init_linear(k, dims[i], dims[i + 1]) for i, k in enumerate(wkeys)]

    fwd = jax.jit(functools.partial(individual_net_forward, batch_tile=2048))
    y = fwd(x, params)
    jax.block_until_ready(y)

    y_ref = _reference_forward(x, params)
    assert y.shape == (batch, n_output)
    max_err = float(jnp.max(jnp.abs(y - y_ref)))
    assert max_err < 5e-3, f"mismatch vs JAX reference: max abs err {max_err}"

    print("KERNEL_OK")
</pallas_src>

<mosaic_0001>
module attributes {stable_mosaic.version = 11 : i64} {
  func.func @kernel(%arg0: i32, %arg1: memref<1024x32xf32, #tpu.memory_space<vmem>>, %arg2: memref<64x32xbf16, #tpu.memory_space<vmem>>, %arg3: memref<64x1xf32, #tpu.memory_space<vmem>>, %arg4: memref<32x64xbf16, #tpu.memory_space<vmem>>, %arg5: memref<32x1xf32, #tpu.memory_space<vmem>>, %arg6: memref<32x1xf32, #tpu.memory_space<vmem>>, %arg7: memref<1x1xf32, #tpu.memory_space<vmem>>, %arg8: memref<1x1024xf32, #tpu.memory_space<vmem>>) attributes {dimension_semantics = [#tpu.dimension_semantics<parallel>], iteration_bounds = array<i64: 2>, scalar_prefetch = 0 : i64, scratch_operands = 0 : i64, tpu.core_type = #tpu.core_type<tc>, window_params = [{transform_indices = @transform_0, window_bounds = array<i64: 1024, 32>}, {pipeline_mode = #tpu.pipeline_mode<synchronous>, transform_indices = @transform_1, window_bounds = array<i64: 64, 32>}, {pipeline_mode = #tpu.pipeline_mode<synchronous>, transform_indices = @transform_2, window_bounds = array<i64: 64, 1>}, {pipeline_mode = #tpu.pipeline_mode<synchronous>, transform_indices = @transform_3, window_bounds = array<i64: 32, 64>}, {pipeline_mode = #tpu.pipeline_mode<synchronous>, transform_indices = @transform_4, window_bounds = array<i64: 32, 1>}, {pipeline_mode = #tpu.pipeline_mode<synchronous>, transform_indices = @transform_5, window_bounds = array<i64: 32, 1>}, {pipeline_mode = #tpu.pipeline_mode<synchronous>, transform_indices = @transform_6, window_bounds = array<i64: 1, 1>}, {transform_indices = @transform_7, window_bounds = array<i64: 1, 1024>}]} {
    %c0 = arith.constant 0 : index
    %c0_0 = arith.constant 0 : index
    %0 = vector.load %arg2[%c0, %c0_0] : memref<64x32xbf16, #tpu.memory_space<vmem>>, vector<64x32xbf16>
    %c0_1 = arith.constant 0 : index
    %c0_2 = arith.constant 0 : index
    %1 = vector.load %arg4[%c0_1, %c0_2] : memref<32x64xbf16, #tpu.memory_space<vmem>>, vector<32x64xbf16>
    %c0_3 = arith.constant 0 : index
    %c0_4 = arith.constant 0 : index
    %2 = vector.load %arg3[%c0_3, %c0_4] : memref<64x1xf32, #tpu.memory_space<vmem>>, vector<64x1xf32>
    %c0_5 = arith.constant 0 : index
    %c0_6 = arith.constant 0 : index
    %3 = vector.load %arg5[%c0_5, %c0_6] : memref<32x1xf32, #tpu.memory_space<vmem>>, vector<32x1xf32>
    %c0_7 = arith.constant 0 : index
    %c0_8 = arith.constant 0 : index
    %4 = vector.load %arg6[%c0_7, %c0_8] : memref<32x1xf32, #tpu.memory_space<vmem>>, vector<32x1xf32>
    %c0_9 = arith.constant 0 : index
    %c0_10 = arith.constant 0 : index
    %5 = vector.load %arg7[%c0_9, %c0_10] : memref<1x1xf32, #tpu.memory_space<vmem>>, vector<1x1xf32>
    %c0_i32 = arith.constant 0 : i32
    %c512_i32 = arith.constant 512 : i32
    %6 = arith.muli %c0_i32, %c512_i32 : i32
    %7 = tpu.assume_multiple %6, 128 : i32
    %8 = arith.index_cast %7 : i32 to index
    %c0_11 = arith.constant 0 : index
    %9 = vector.load %arg1[%8, %c0_11] : memref<1024x32xf32, #tpu.memory_space<vmem>>, vector<512x32xf32>
    %10 = arith.truncf %9 : vector<512x32xf32> to vector<512x32xbf16>
    %cst = arith.constant dense<0.000000e+00> : vector<64x512xf32>
    %11 = tpu.matmul %0, %10, %cst {dimension_numbers = #tpu.dot_dimension_numbers<[1], [1], [0], [0], [0, 0, 1, 0], [], []>} : vector<64x32xbf16>, vector<512x32xbf16>, vector<64x512xf32> -> vector<64x512xf32>
    %12 = vector.broadcast %2 : vector<64x1xf32> to vector<64x512xf32>
    %13 = arith.addf %11, %12 : vector<64x512xf32>
    %cst_12 = arith.constant 0.000000e+00 : f32
    %14 = vector.broadcast %cst_12 : f32 to vector<64x512xf32>
    %15 = arith.maximumf %13, %14 : vector<64x512xf32>
    %16 = arith.truncf %15 : vector<64x512xf32> to vector<64x512xbf16>
    %cst_13 = arith.constant dense<0.000000e+00> : vector<32x512xf32>
    %17 = tpu.matmul %1, %16, %cst_13 {dimension_numbers = #tpu.dot_dimension_numbers<[1], [0], [0], [1], [0, 0, 1, 1], [], []>} : vector<32x64xbf16>, vector<64x512xbf16>, vector<32x512xf32> -> vector<32x512xf32>
    %18 = vector.broadcast %3 : vector<32x1xf32> to vector<32x512xf32>
    %19 = arith.addf %17, %18 : vector<32x512xf32>
    %cst_14 = arith.constant 0.000000e+00 : f32
    %20 = vector.broadcast %cst_14 : f32 to vector<32x512xf32>
    %21 = arith.maximumf %19, %20 : vector<32x512xf32>
    %22 = vector.broadcast %4 : vector<32x1xf32> to vector<32x512xf32>
    %23 = arith.mulf %21, %22 : vector<32x512xf32>
    %cst_15 = arith.constant dense<0.000000e+00> : vector<512xf32>
    %24 = vector.multi_reduction <add>, %23, %cst_15 [0] : vector<32x512xf32> to vector<512xf32>
    %25 = vector.shape_cast %24 : vector<512xf32> to vector<1x512xf32>
    %26 = vector.broadcast %5 : vector<1x1xf32> to vector<1x512xf32>
    %27 = arith.addf %25, %26 : vector<1x512xf32>
    %cst_16 = arith.constant 0.000000e+00 : f32
    %28 = vector.broadcast %cst_16 : f32 to vector<1x512xf32>
    %29 = arith.subf %28, %27 : vector<1x512xf32>
    %30 = math.exp %29 : vector<1x512xf32>
    %cst_17 = arith.constant 1.000000e+00 : f32
    %31 = vector.broadcast %cst_17 : f32 to vector<1x512xf32>
    %32 = arith.addf %31, %30 : vector<1x512xf32>
    %cst_18 = arith.constant 1.000000e+00 : f32
    %33 = vector.broadcast %cst_18 : f32 to vector<1x512xf32>
    %34 = arith.divf %33, %32 : vector<1x512xf32>
    %c0_19 = arith.constant 0 : index
    %35 = arith.index_cast %7 : i32 to index
    %36 = vector.load %arg8[%c0_19, %35] : memref<1x1024xf32, #tpu.memory_space<vmem>>, vector<1x512xf32>
    tpu.vector_store %arg8[%c0_19, %35], %34 {strides = array<i32>} : memref<1x1024xf32, #tpu.memory_space<vmem>>, vector<1x512xf32>,
    %c1_i32 = arith.constant 1 : i32
    %c512_i32_20 = arith.constant 512 : i32
    %37 = arith.muli %c1_i32, %c512_i32_20 : i32
    %38 = tpu.assume_multiple %37, 128 : i32
    %39 = arith.index_cast %38 : i32 to index
    %c0_21 = arith.constant 0 : index
    %40 = vector.load %arg1[%39, %c0_21] : memref<1024x32xf32, #tpu.memory_space<vmem>>, vector<512x32xf32>
    %41 = arith.truncf %40 : vector<512x32xf32> to vector<512x32xbf16>
    %cst_22 = arith.constant dense<0.000000e+00> : vector<64x512xf32>
    %42 = tpu.matmul %0, %41, %cst_22 {dimension_numbers = #tpu.dot_dimension_numbers<[1], [1], [0], [0], [0, 0, 1, 0], [], []>} : vector<64x32xbf16>, vector<512x32xbf16>, vector<64x512xf32> -> vector<64x512xf32>
    %43 = vector.broadcast %2 : vector<64x1xf32> to vector<64x512xf32>
    %44 = arith.addf %42, %43 : vector<64x512xf32>
    %cst_23 = arith.constant 0.000000e+00 : f32
    %45 = vector.broadcast %cst_23 : f32 to vector<64x512xf32>
    %46 = arith.maximumf %44, %45 : vector<64x512xf32>
    %47 = arith.truncf %46 : vector<64x512xf32> to vector<64x512xbf16>
    %cst_24 = arith.constant dense<0.000000e+00> : vector<32x512xf32>
    %48 = tpu.matmul %1, %47, %cst_24 {dimension_numbers = #tpu.dot_dimension_numbers<[1], [0], [0], [1], [0, 0, 1, 1], [], []>} : vector<32x64xbf16>, vector<64x512xbf16>, vector<32x512xf32> -> vector<32x512xf32>
    %49 = vector.broadcast %3 : vector<32x1xf32> to vector<32x512xf32>
    %50 = arith.addf %48, %49 : vector<32x512xf32>
    %cst_25 = arith.constant 0.000000e+00 : f32
    %51 = vector.broadcast %cst_25 : f32 to vector<32x512xf32>
    %52 = arith.maximumf %50, %51 : vector<32x512xf32>
    %53 = vector.broadcast %4 : vector<32x1xf32> to vector<32x512xf32>
    %54 = arith.mulf %52, %53 : vector<32x512xf32>
    %cst_26 = arith.constant dense<0.000000e+00> : vector<512xf32>
    %55 = vector.multi_reduction <add>, %54, %cst_26 [0] : vector<32x512xf32> to vector<512xf32>
    %56 = vector.shape_cast %55 : vector<512xf32> to vector<1x512xf32>
    %57 = vector.broadcast %5 : vector<1x1xf32> to vector<1x512xf32>
    %58 = arith.addf %56, %57 : vector<1x512xf32>
    %cst_27 = arith.constant 0.000000e+00 : f32
    %59 = vector.broadcast %cst_27 : f32 to vector<1x512xf32>
    %60 = arith.subf %59, %58 : vector<1x512xf32>
    %61 = math.exp %60 : vector<1x512xf32>
    %cst_28 = arith.constant 1.000000e+00 : f32
    %62 = vector.broadcast %cst_28 : f32 to vector<1x512xf32>
    %63 = arith.addf %62, %61 : vector<1x512xf32>
    %cst_29 = arith.constant 1.000000e+00 : f32
    %64 = vector.broadcast %cst_29 : f32 to vector<1x512xf32>
    %65 = arith.divf %64, %63 : vector<1x512xf32>
    %c0_30 = arith.constant 0 : index
    %66 = arith.index_cast %38 : i32 to index
    %67 = vector.load %arg8[%c0_30, %66] : memref<1x1024xf32, #tpu.memory_space<vmem>>, vector<1x512xf32>
    tpu.vector_store %arg8[%c0_30, %66], %65 {strides = array<i32>} : memref<1x1024xf32, #tpu.memory_space<vmem>>, vector<1x512xf32>,
    %c2_i32 = arith.constant 2 : i32
    return
  }
  func.func @transform_0(%arg0: i32) -> (i32, i32) {
    %c0_i32 = arith.constant 0 : i32
    %c0_i32_0 = arith.constant 0 : i32
    return %arg0, %c0_i32 : i32, i32
  }
  func.func @transform_1(%arg0: i32) -> (i32, i32) {
    %c0_i32 = arith.constant 0 : i32
    %c0_i32_0 = arith.constant 0 : i32
    %c0_i32_1 = arith.constant 0 : i32
    return %c0_i32, %c0_i32_0 : i32, i32
  }
  func.func @transform_2(%arg0: i32) -> (i32, i32) {
    %c0_i32 = arith.constant 0 : i32
    %c0_i32_0 = arith.constant 0 : i32
    %c0_i32_1 = arith.constant 0 : i32
    return %c0_i32, %c0_i32_0 : i32, i32
  }
  func.func @transform_3(%arg0: i32) -> (i32, i32) {
    %c0_i32 = arith.constant 0 : i32
    %c0_i32_0 = arith.constant 0 : i32
    %c0_i32_1 = arith.constant 0 : i32
    return %c0_i32, %c0_i32_0 : i32, i32
  }
  func.func @transform_4(%arg0: i32) -> (i32, i32) {
    %c0_i32 = arith.constant 0 : i32
    %c0_i32_0 = arith.constant 0 : i32
    %c0_i32_1 = arith.constant 0 : i32
    return %c0_i32, %c0_i32_0 : i32, i32
  }
  func.func @transform_5(%arg0: i32) -> (i32, i32) {
    %c0_i32 = arith.constant 0 : i32
    %c0_i32_0 = arith.constant 0 : i32
    %c0_i32_1 = arith.constant 0 : i32
    return %c0_i32, %c0_i32_0 : i32, i32
  }
  func.func @transform_6(%arg0: i32) -> (i32, i32) {
    %c0_i32 = arith.constant 0 : i32
    %c0_i32_0 = arith.constant 0 : i32
    %c0_i32_1 = arith.constant 0 : i32
    return %c0_i32, %c0_i32_0 : i32, i32
  }
  func.func @transform_7(%arg0: i32) -> (i32, i32) {
    %c0_i32 = arith.constant 0 : i32
    %c0_i32_0 = arith.constant 0 : i32
    return %c0_i32, %arg0 : i32, i32
  }
}

</mosaic_0001>

<bundles_post_ra>
// kernel: individual_net_forward.1
= control target key start
LH: loop header
LB: loop body
LE: loop exit
PB: predicated region body
PF: predicated region fallthrough
CT: control target
= control target key end

     0   :  { %s2894_s0 = inlined_call_operand.vmem [shape: f32[1500,32], index: 0, kind: input, shape index: {}]   ;;  %s2895_s1 = inlined_call_operand.vmem [shape: bf16[64,32], index: 1, kind: input, shape index: {}]   ;;  %s2896_s2 = inlined_call_operand.vmem [shape: f32[64,1], index: 2, kind: input, shape index: {}]   ;;  %s2897_s3 = inlined_call_operand.vmem [shape: bf16[32,64], index: 3, kind: input, shape index: {}]   ;;  %s2898_s4 = inlined_call_operand.vmem [shape: f32[32,1], index: 4, kind: input, shape index: {}]   ;;  %s2899_s5 = inlined_call_operand.vmem [shape: f32[32,1], index: 5, kind: input, shape index: {}]   ;;  %s2900_s6 = inlined_call_operand.<no memory space> [shape: f32[1,1], index: 6, kind: input, shape index: {}]   ;;  %s2901_s7 = inlined_call_operand.hbm [shape: f32[1,1500], index: 7, kind: output, shape index: {}]  }
   0x1   :  { %v12_v0 = vstv %s2900_s6 }
   0x2   :  { %13 = vst [vmem:[#allocation2] sm:$0x1] %v12_v0 }
   0x3   :  { %14 = vsyncpa [#allocation4], 0 }
   0x4   :  { %16 = vsyncpa [#allocation4 + $0x1], 0  ;;  %s2224_s26 = smov 0   ;;  %s2226_s27 = smov 0  }
   0x5   :  { %s2228_s28 = smov 0   ;;  %s2230_s29 = smov 0  }
   0x6 LB: > { %s2245_s6 = sadd.s32 4294967295, %s2176_s29   ;;  %s1796_s30 = sadd.s32 4294967294, %s2176_s29   ;;  %s2176_s29 = sphi %s2230_s29, %s2909_s29   ;;  %s2172_s28 = sphi %s2228_s28, %s2908_s28   ;;  %s2168_s27 = sphi %s2226_s27, %s2907_s27   ;;  %s2164_s26 = sphi %s2224_s26, %s2906_s26  }
   0x7   : > { %s2249_s8 = sadd.s32 1, %s2176_s29   ;;  %s181_s9 = sadd.s32 1, %s2172_s28 }
   0x8   : > { %s178_s10 = ssub.s32 %s2176_s29, %s2249_s8  ;;  %p191_p0 = scmp.ne.s32.totalorder %s2172_s28, %s2168_s27 }
   0x9   : > { %p179_p1 = scmp.eq.s32.totalorder %s178_s10, 0  ;;  %p192_p2 = scmp.eq.s32.totalorder %s2245_s6, 1 }
   0xa   : > { %p197_p3 = scmp.ne.s32.totalorder %s2168_s27, %s2164_s26  ;;  %p198_p4 = scmp.eq.s32.totalorder %s1796_s30, 1 }
   0xb   : > { %s2260_s11 = scalar_select %p179_p1, %s2172_s28, %s181_s9  }
   0xc   : > { %p2262_p5 = por %p192_p2, %p191_p0  ;;  %p2266_p6 = por %p198_p4, %p197_p3 }
   0xd   : > { %p1799_p7 = scmp.ge.s32.totalorder %s2176_s29, 1  ;;  %p251_p8 = scmp.lt.s32.totalorder %s2176_s29, 3 }
   0xf   : > { %p252_p9 = pnand %p1799_p7, %p251_p8 }
  0x10   : > { %s2273_s14 = sshll.u32 (!%p252_p9), %s2245_s6, 7  ;;  %v2279_v1 = vld [vmem:[%s2895_s1] sm:$0xff] (!%p252_p9)   ;;  %vm492_vm0 = vcmask (!%p252_p9), 261120   ;;  %v2178_v2 = vmov (!%p252_p9), 0   ;;  %v321_v4 = vld [vmem:[%s2896_s2 + $0x10] sm:$0xff] (!%p252_p9)  ;;  %v320_v5 = vld [vmem:[%s2896_s2 + $0x8] sm:$0xff] (!%p252_p9) }
  0x11   : > { %255 = sbr.rel (%p252_p9) target bundleno = 975 (0x3cf), region = 48  ;;  %p292_p10 = scmp.lt.s32.totalorder (!%p252_p9), %s2273_s14, 187  ;;  %1922 = vmatprep.mubr.msk.bf16.mxu0 (!%p252_p9), %vm492_vm0, %v2279_v1  ;;  %1946 = vmatprep.mubr.msk.bf16.mxu1 (!%p252_p9), %vm492_vm0, %v2279_v1  ;;  %v319_v3 = vld [vmem:[%s2896_s2] sm:$0xff] (!%p252_p9)  ;;  %v322_v6 = vld [vmem:[%s2896_s2 + $0x18] sm:$0xff] (!%p252_p9)  ;;  %v324_v32 = vld [vmem:[%s2896_s2 + $0x28] sm:$0xff] (!%p252_p9)  ;;  %vm825_vm1 = vcmask (!%p252_p9), 523264  }
  0x12   : > { %2074 = vset.pattern.permute.xlu0 (!%p252_p9), %v2178_v2  ;;  %2075 = vset.pattern.permute.xlu1 (!%p252_p9), %v2178_v2  ;;  %v323_v19 = vld [vmem:[%s2896_s2 + $0x20] sm:$0xff] (!%p252_p9)  ;;  %v325_v39 = vld [vmem:[%s2896_s2 + $0x30] sm:$0xff] (!%p252_p9)  ;;  %v326_v0 = vld [vmem:[%s2896_s2 + $0x38] sm:$0xff] (!%p252_p9) }
  0x13   : > { %434 = vperm.xlu0 (!%p252_p9), %2074, %v319_v3   ;;  %444 = vperm.xlu1 (!%p252_p9), %2075, %v321_v4   ;;  %v327_v48 = vld [vmem:[%s2898_s4] sm:$0xff] (!%p252_p9)  ;;  %v329_v63 = vld [vmem:[%s2898_s4 + $0x10] sm:$0xff] (!%p252_p9) }
  0x17   : > { %439 = vperm.xlu0 (!%p252_p9), %2074, %v320_v5   ;;  %449 = vperm.xlu1 (!%p252_p9), %2075, %v322_v6  }
  0x18   : > { %s293_s17 = scalar_select %p292_p10, %s2273_s14, 187 }
  0x19   : > { %s1899_s10 = sshll.u32 (%p2262_p5), %s2245_s6, 3 }
  0x1a   : > { %s1802_s20 = sshll.u32 %s293_s17, 3  ;;  %s1726_s15 = ssub.s32 (%p2262_p5), 12, %s1899_s10 }
  0x1b   : > { %s2297_s25 = scalar_lea.vmem %s2894_s0, %s1802_s20  ;;  %454 = vperm.xlu0 %2074, %v323_v19   ;;  %459 = vperm.xlu1 %2075, %v324_v32   ;;  %v333_v19 = vld [vmem:[%s2899_s5 + $0x10] sm:$0xff]  ;;  %p1727_p11 = scmp.lt.s32.totalorder (%p2262_p5), %s1726_s15, 8 }
  0x1c   : > { %v352_v7 = vld [vmem:[%s2297_s25 + $0x80] sm:$0xff]  ;;  %v353_v8 = vld [vmem:[%s2297_s25 + $0x88] sm:$0xff]  ;;  %v354_v18 = vld [vmem:[%s2297_s25 + $0x90] sm:$0xff] }
  0x1d   : > { %v384_v9 = vld [vmem:[%s2297_s25 + $0x180] sm:$0xff]  ;;  %v408_v10 = vpack.c.bf16 %v353_v8, %v352_v7  ;;  %v385_v11 = vld [vmem:[%s2297_s25 + $0x188] sm:$0xff]  ;;  %v355_v21 = vld [vmem:[%s2297_s25 + $0x98] sm:$0xff] }
  0x1e   : > { %v336_v12 = vld [vmem:[%s2297_s25] sm:$0xff]  ;;  %v337_v13 = vld [vmem:[%s2297_s25 + $0x8] sm:$0xff]  ;;  %v424_v14 = vpack.c.bf16 %v385_v11, %v384_v9  ;;  %v386_v22 = vld [vmem:[%s2297_s25 + $0x190] sm:$0xff]  ;;  %v409_v25 = vpack.c.bf16 %v355_v21, %v354_v18 }
  0x1f   : > { %v400_v15 = vpack.c.bf16 %v337_v13, %v336_v12  ;;  %v368_v16 = vld [vmem:[%s2297_s25 + $0x100] sm:$0xff]  ;;  %v369_v17 = vld [vmem:[%s2297_s25 + $0x108] sm:$0xff]  ;;  %2002 = vmatprep.subr.msk.bf16.mxu0 %vm492_vm0, %v408_v10  ;;  %v387_v23 = vld [vmem:[%s2297_s25 + $0x198] sm:$0xff]  ;;  %464 = vperm.xlu0 %2074, %v325_v39  }
  0x20   : > { %v416_v20 = vpack.c.bf16 %v369_v17, %v368_v16  ;;  %2010 = vmatprep.subr.msk.bf16.mxu1 %vm492_vm0, %v424_v14  ;;  %v425_v26 = vpack.c.bf16 %v387_v23, %v386_v22  ;;  %v338_v27 = vld [vmem:[%s2297_s25 + $0x10] sm:$0xff]  ;;  %v339_v28 = vld [vmem:[%s2297_s25 + $0x18] sm:$0xff]  ;;  %v356_v35 = vld [vmem:[%s2297_s25 + $0xa0] sm:$0xff]  ;;  %469 = vperm.xlu1 %2075, %v326_v0  }
  0x21   : > { %v506_v24 = vsel %vm492_vm0, %v400_v15, 0  ;;  %v370_v29 = vld [vmem:[%s2297_s25 + $0x110] sm:$0xff]  ;;  %v371_v31 = vld [vmem:[%s2297_s25 + $0x118] sm:$0xff]  ;;  %v401_v33 = vpack.c.bf16 %v339_v28, %v338_v27  ;;  %v357_v36 = vld [vmem:[%s2297_s25 + $0xa8] sm:$0xff] }
  0x22   : > { %1907 = vmatpush3.bf16.xpose.msra.mxu0 %v506_v24  ;;  %v554_v30 = vsel %vm492_vm0, %v416_v20, 0  ;;  %v417_v34 = vpack.c.bf16 %v371_v31, %v370_v29  ;;  %v388_v37 = vld [vmem:[%s2297_s25 + $0x1a0] sm:$0xff]  ;;  %v389_v38 = vld [vmem:[%s2297_s25 + $0x1a8] sm:$0xff]  ;;  %v410_v41 = vpack.c.bf16 %v357_v36, %v356_v35  ;;  %v358_v51 = vld [vmem:[%s2297_s25 + $0xb0] sm:$0xff] }
  0x23   : > { %1931 = vmatpush3.bf16.xpose.msra.mxu1 %v554_v30  ;;  %2003 = vmatprep.subr.msk.bf16.mxu0 %vm492_vm0, %v409_v25  ;;  %v509_v40 = vsel %vm492_vm0, %v401_v33, 0  ;;  %v426_v43 = vpack.c.bf16 %v389_v38, %v388_v37  ;;  %v340_v44 = vld [vmem:[%s2297_s25 + $0x20] sm:$0xff]  ;;  %v341_v45 = vld [vmem:[%s2297_s25 + $0x28] sm:$0xff]  ;;  %v359_v52 = vld [vmem:[%s2297_s25 + $0xb8] sm:$0xff] }
  0x24   : > { %2011 = vmatprep.subr.msk.bf16.mxu1 %vm492_vm0, %v425_v26  ;;  %v557_v42 = vsel %vm492_vm0, %v417_v34, 0  ;;  %v372_v46 = vld [vmem:[%s2297_s25 + $0x120] sm:$0xff]  ;;  %v373_v47 = vld [vmem:[%s2297_s25 + $0x128] sm:$0xff]  ;;  %v402_v49 = vpack.c.bf16 %v341_v45, %v340_v44  ;;  %797 = vperm.xlu0 %2074, %v327_v48   ;;  %v390_v53 = vld [vmem:[%s2297_s25 + $0x1b0] sm:$0xff]  ;;  %v411_v56 = vpack.c.bf16 %v359_v52, %v358_v51 }
  0x25   : > { %v418_v50 = vpack.c.bf16 %v373_v47, %v372_v46  ;;  %v391_v54 = vld [vmem:[%s2297_s25 + $0x1b8] sm:$0xff]  ;;  %v342_v59 = vld [vmem:[%s2297_s25 + $0x30] sm:$0xff]  ;;  %v360_v4 = vld [vmem:[%s2297_s25 + $0xc0] sm:$0xff] }
  0x26   : > { %v512_v55 = vsel %vm492_vm0, %v402_v49, 0  ;;  %v427_v58 = vpack.c.bf16 %v391_v54, %v390_v53  ;;  %v343_v60 = vld [vmem:[%s2297_s25 + $0x38] sm:$0xff]  ;;  %v374_v61 = vld [vmem:[%s2297_s25 + $0x130] sm:$0xff]  ;;  %v361_v6 = vld [vmem:[%s2297_s25 + $0xc8] sm:$0xff] }
  0x27   : > { %v560_v57 = vsel %vm492_vm0, %v418_v50, 0  ;;  %v375_v62 = vld [vmem:[%s2297_s25 + $0x138] sm:$0xff]  ;;  %v403_v3 = vpack.c.bf16 %v343_v60, %v342_v59  ;;  %v392_v7 = vld [vmem:[%s2297_s25 + $0x1c0] sm:$0xff]  ;;  %v393_v8 = vld [vmem:[%s2297_s25 + $0x1c8] sm:$0xff]  ;;  %v412_v12 = vpack.c.bf16 %v361_v6, %v360_v4 }
  0x28   : > { %v419_v5 = vpack.c.bf16 %v375_v62, %v374_v61  ;;  %807 = vperm.xlu0 %2074, %v329_v63   ;;  %v331_v9 = vld [vmem:[%s2899_s5] sm:$0xff]  ;;  %v328_v10 = vld [vmem:[%s2898_s4 + $0x8] sm:$0xff]  ;;  %v428_v14 = vpack.c.bf16 %v393_v8, %v392_v7  ;;  %v330_v20 = vld [vmem:[%s2898_s4 + $0x18] sm:$0xff] }
  0x29   : > { %v515_v11 = vsel %vm492_vm0, %v403_v3, 0  ;;  %v344_v15 = vld [vmem:[%s2297_s25 + $0x40] sm:$0xff]  ;;  %v345_v16 = vld [vmem:[%s2297_s25 + $0x48] sm:$0xff]  ;;  %802 = vperm.xlu1 %2075, %v328_v10   ;;  %v362_v23 = vld [vmem:[%s2297_s25 + $0xd0] sm:$0xff] }
  0x2a   : > { %1909 = vmatpush3.bf16.xpose.msra.mxu0 %v509_v40  ;;  %v563_v13 = vsel %vm492_vm0, %v419_v5, 0  ;;  %v376_v17 = vld [vmem:[%s2297_s25 + $0x140] sm:$0xff]  ;;  %v377_v18 = vld [vmem:[%s2297_s25 + $0x148] sm:$0xff]  ;;  %v404_v21 = vpack.c.bf16 %v345_v16, %v344_v15  ;;  %v363_v24 = vld [vmem:[%s2297_s25 + $0xd8] sm:$0xff] }
  0x2b   : > { %1933 = vmatpush3.bf16.xpose.msra.mxu1 %v557_v42  ;;  %2004 = vmatprep.subr.msk.bf16.mxu0 %vm492_vm0, %v410_v41  ;;  %v420_v22 = vpack.c.bf16 %v377_v18, %v376_v17  ;;  %v394_v25 = vld [vmem:[%s2297_s25 + $0x1d0] sm:$0xff]  ;;  %v395_v26 = vld [vmem:[%s2297_s25 + $0x1d8] sm:$0xff]  ;;  %v335_v27 = vld [vmem:[#allocation2] sm:$0x1]  ;;  %v413_v30 = vpack.c.bf16 %v363_v24, %v362_v23 }
  0x2c   : > { %2012 = vmatprep.subr.msk.bf16.mxu1 %vm492_vm0, %v426_v43  ;;  %956 = vperm.xlu0 %2074, %v331_v9   ;;  %v332_v28 = vld [vmem:[%s2899_s5 + $0x8] sm:$0xff]  ;;  %v518_v29 = vsel %vm492_vm0, %v404_v21, 0  ;;  %v429_v32 = vpack.c.bf16 %v395_v26, %v394_v25  ;;  %v346_v33 = vld [vmem:[%s2297_s25 + $0x50] sm:$0xff]  ;;  %v347_v34 = vld [vmem:[%s2297_s25 + $0x58] sm:$0xff] }
  0x2d   : > { %812 = vperm.xlu1 %2075, %v330_v20   ;;  %v566_v31 = vsel %vm492_vm0, %v420_v22, 0  ;;  %v378_v35 = vld [vmem:[%s2297_s25 + $0x150] sm:$0xff]  ;;  %v379_v36 = vld [vmem:[%s2297_s25 + $0x158] sm:$0xff]  ;;  %v405_v38 = vpack.c.bf16 %v347_v34, %v346_v33  ;;  %v364_v40 = vld [vmem:[%s2297_s25 + $0xe0] sm:$0xff] }
  0x2e   : > { %v334_v37 = vld [vmem:[%s2899_s5 + $0x18] sm:$0xff]  ;;  %v421_v39 = vpack.c.bf16 %v379_v36, %v378_v35  ;;  %v365_v41 = vld [vmem:[%s2297_s25 + $0xe8] sm:$0xff]  ;;  %v396_v42 = vld [vmem:[%s2297_s25 + $0x1e0] sm:$0xff] }
  0x2f   : > { %v397_v43 = vld [vmem:[%s2297_s25 + $0x1e8] sm:$0xff]  ;;  %v521_v44 = vsel %vm492_vm0, %v405_v38, 0  ;;  %v414_v45 = vpack.c.bf16 %v365_v41, %v364_v40  ;;  %v348_v48 = vld [vmem:[%s2297_s25 + $0x60] sm:$0xff]  ;;  %v366_v54 = vld [vmem:[%s2297_s25 + $0xf0] sm:$0xff] }
  0x30   : > { %966 = vperm.xlu0 %2074, %v333_v19   ;;  %v569_v46 = vsel %vm492_vm0, %v421_v39, 0  ;;  %v430_v47 = vpack.c.bf16 %v397_v43, %v396_v42  ;;  %v349_v49 = vld [vmem:[%s2297_s25 + $0x68] sm:$0xff]  ;;  %v380_v50 = vld [vmem:[%s2297_s25 + $0x160] sm:$0xff]  ;;  %v350_v62 = vld [vmem:[%s2297_s25 + $0x70] sm:$0xff] }
  0x31   : > { %961 = vperm.xlu1 %2075, %v332_v28   ;;  %v381_v51 = vld [vmem:[%s2297_s25 + $0x168] sm:$0xff]  ;;  %v406_v52 = vpack.c.bf16 %v349_v49, %v348_v48  ;;  %v351_v63 = vld [vmem:[%s2297_s25 + $0x78] sm:$0xff]  ;;  %v382_v0 = vld [vmem:[%s2297_s25 + $0x170] sm:$0xff] }
  0x32   : > { %1911 = vmatpush3.bf16.xpose.msra.mxu0 %v512_v55  ;;  %v422_v53 = vpack.c.bf16 %v381_v51, %v380_v50  ;;  %v367_v55 = vld [vmem:[%s2297_s25 + $0xf8] sm:$0xff]  ;;  %v407_v4 = vpack.c.bf16 %v351_v63, %v350_v62  ;;  %v2440_v8 = vld [vmem:[%s2895_s1 + $0x8] sm:$0xff]   ;;  %v2453_v9 = vld [vmem:[%s2895_s1 + $0x10] sm:$0xff]  }
  0x33   : > { %1935 = vmatpush3.bf16.xpose.msra.mxu1 %v560_v57  ;;  %2005 = vmatprep.subr.msk.bf16.mxu0 %vm492_vm0, %v411_v56  ;;  %v398_v56 = vld [vmem:[%s2297_s25 + $0x1f0] sm:$0xff]  ;;  %v399_v57 = vld [vmem:[%s2297_s25 + $0x1f8] sm:$0xff]  ;;  %v415_v59 = vpack.c.bf16 %v367_v55, %v366_v54 }
  0x34   : > { %2013 = vmatprep.subr.msk.bf16.mxu1 %vm492_vm0, %v427_v58  ;;  %1028 = vperm.xlu0 %2074, %v335_v27   ;;  %v524_v58 = vsel %vm492_vm0, %v406_v52, 0  ;;  %v572_v60 = vsel %vm492_vm0, %v422_v53, 0  ;;  %v431_v61 = vpack.c.bf16 %v399_v57, %v398_v56  ;;  %v383_v3 = vld [vmem:[%s2297_s25 + $0x178] sm:$0xff]  ;;  %v527_v6 = vsel %vm492_vm0, %v407_v4, 0 }
  0x35   : > { %971 = vperm.xlu1 %2075, %v334_v37   ;;  %v423_v5 = vpack.c.bf16 %v383_v3, %v382_v0  ;;  %v2466_v10 = vld [vmem:[%s2895_s1 + $0x18] sm:$0xff]  }
  0x37   : > { %v575_v7 = vsel %vm492_vm0, %v423_v5, 0 }
  0x3a   : > { %1913 = vmatpush3.bf16.xpose.msra.mxu0 %v515_v11 }
  0x3b   : > { %1937 = vmatpush3.bf16.xpose.msra.mxu1 %v563_v13  ;;  %2006 = vmatprep.subr.msk.bf16.mxu0 %vm492_vm0, %v412_v12 }
  0x3c   : > { %2014 = vmatprep.subr.msk.bf16.mxu1 %vm492_vm0, %v428_v14 }
  0x42   : > { %1915 = vmatpush3.bf16.xpose.msra.mxu0 %v518_v29 }
  0x43   : > { %1939 = vmatpush3.bf16.xpose.msra.mxu1 %v566_v31  ;;  %2007 = vmatprep.subr.msk.bf16.mxu0 %vm492_vm0, %v413_v30 }
  0x44   : > { %2015 = vmatprep.subr.msk.bf16.mxu1 %vm492_vm0, %v429_v32 }
  0x4a   : > { %1917 = vmatpush3.bf16.xpose.msra.mxu0 %v521_v44 }
  0x4b   : > { %1941 = vmatpush3.bf16.xpose.msra.mxu1 %v569_v46  ;;  %2008 = vmatprep.subr.msk.bf16.mxu0 %vm492_vm0, %v414_v45 }
  0x4c   : > { %2016 = vmatprep.subr.msk.bf16.mxu1 %vm492_vm0, %v430_v47 }
  0x52   : > { %1919 = vmatpush3.bf16.xpose.msra.mxu0 %v524_v58 }
  0x53   : > { %1943 = vmatpush3.bf16.xpose.msra.mxu1 %v572_v60  ;;  %2009 = vmatprep.subr.msk.bf16.mxu0 %vm492_vm0, %v415_v59 }
  0x54   : > { %2017 = vmatprep.subr.msk.bf16.mxu1 %vm492_vm0, %v431_v61 }
  0x5a   : > { %1921 = vmatpush3.bf16.xpose.msra.mxu0 %v527_v6 }
  0x5b   : > { %1945 = vmatpush3.bf16.xpose.msra.mxu1 %v575_v7 }
  0x61   : > { %1923 = vmatmul.mubr.msk.bf16.vlgmr.msra.gmra.mrb[0].mxu0 %vm492_vm0, %v2279_v1 }
  0x62   : > { %1947 = vmatmul.mubr.msk.bf16.vlgmr.msra.gmra.mrb[0].mxu1 %vm492_vm0, %v2279_v1  ;;  %1924 = vmatprep.mubr.msk.bf16.mxu0 %vm492_vm0, %v2440_v8 }
  0x63   : > { %1948 = vmatprep.mubr.msk.bf16.mxu1 %vm492_vm0, %v2440_v8 }
  0x69   : > { %1925 = vmatmul.mubr.msk.bf16.gmra.mrb[4].mxu0 %vm492_vm0, %v2440_v8 }
  0x6a   : > { %1949 = vmatmul.mubr.msk.bf16.gmra.mrb[4].mxu1 %vm492_vm0, %v2440_v8  ;;  %1926 = vmatprep.mubr.msk.bf16.mxu0 %vm492_vm0, %v2453_v9 }
  0x6b   : > { %1950 = vmatprep.mubr.msk.bf16.mxu1 %vm492_vm0, %v2453_v9 }
  0x71   : > { %1927 = vmatmul.mubr.msk.bf16.gmra.mrb[8].mxu0 %vm492_vm0, %v2453_v9 }
  0x72   : > { %1951 = vmatmul.mubr.msk.bf16.gmra.mrb[8].mxu1 %vm492_vm0, %v2453_v9  ;;  %1928 = vmatprep.mubr.msk.bf16.mxu0 %vm492_vm0, %v2466_v10 }
  0x73   : > { %1952 = vmatprep.mubr.msk.bf16.mxu1 %vm492_vm0, %v2466_v10 }
  0x79   : > { %1929 = vmatmul.mubr.msk.bf16.gmra.mrb[12].mxu0 %vm492_vm0, %v2466_v10 }
  0x7a   : > { %1953 = vmatmul.mubr.msk.bf16.gmra.mrb[12].mxu1 %vm492_vm0, %v2466_v10  ;;  %864 = vmatprep.mubr.bf16.mxu0 %v2178_v2 }
  0x7b   : > { %917 = vmatprep.mubr.bf16.mxu1 %v2178_v2 }
  0x92   : > { %v2482_v11 = vpop.permute.xlu0 %434  ;;  %v2484_v12 = vpop.permute.xlu1 %444 }
  0x96   : > { %v2486_v13 = vpop.permute.xlu0 %439  ;;  %v2496_v39 = vpop.permute.xlu1 %449 }
  0x9a   : > { %v2506_v3 = vpop.permute.xlu0 %454  ;;  %v2508_v7 = vpop.permute.xlu1 %459 }
 0x134   : > { %v635_v14 = vpop.f32.mrb[0].mxu0 }
 0x135   : > { %v636_v15 = vadd.f32 %v635_v14, %v2482_v11  ;;  %v708_v16 = vpop.f32.mrb[0].mxu1  ;;  %v637_v17 = vpop.f32.mrb[1].mxu0 }
 0x136   : > { %v709_v18 = vadd.f32 %v708_v16, %v2482_v11  ;;  %v638_v19 = vadd.f32 %v637_v17, %v2482_v11  ;;  %v710_v20 = vpop.f32.mrb[1].mxu1  ;;  %v639_v21 = vpop.f32.mrb[2].mxu0 }
 0x137   : > { %v711_v22 = vadd.f32 %v710_v20, %v2482_v11  ;;  %v640_v23 = vadd.f32 %v639_v21, %v2486_v13  ;;  %v712_v24 = vpop.f32.mrb[2].mxu1  ;;  %v641_v25 = vpop.f32.mrb[3].mxu0  ;;  %v747_v29 = vmax.f32 %v636_v15, 0.0 }
 0x138   : > { %v713_v26 = vadd.f32 %v712_v24, %v2486_v13  ;;  %v642_v27 = vadd.f32 %v641_v25, %v2486_v13  ;;  %v714_v28 = vpop.f32.mrb[3].mxu1  ;;  %v749_v32 = vmax.f32 %v709_v18, 0.0  ;;  %v748_v33 = vmax.f32 %v638_v19, 0.0 }
 0x139   : > { %v751_v30 = vmax.f32 %v640_v23, 0.0  ;;  %v715_v31 = vadd.f32 %v714_v28, %v2486_v13  ;;  %v750_v36 = vmax.f32 %v711_v22, 0.0 }
 0x13a   : > { %v753_v34 = vmax.f32 %v713_v26, 0.0  ;;  %v752_v35 = vmax.f32 %v642_v27, 0.0 }
 0x13b   : > { %v779_v37 = vpack.c.bf16 %v751_v30, %v747_v29  ;;  %v754_v38 = vmax.f32 %v715_v31, 0.0 }
 0x13c   : > { %v781_v40 = vpack.c.bf16 %v753_v34, %v749_v32  ;;  %v780_v41 = vpack.c.bf16 %v752_v35, %v748_v33  ;;  %v645_v42 = vpop.f32.mrb[4].mxu0 }
 0x13d   : > { %v782_v43 = vpack.c.bf16 %v754_v38, %v750_v36  ;;  %v646_v44 = vadd.f32 %v645_v42, %v2484_v12  ;;  %v718_v45 = vpop.f32.mrb[4].mxu1  ;;  %v647_v46 = vpop.f32.mrb[5].mxu0 }
 0x13e   : > { %v719_v47 = vadd.f32 %v718_v45, %v2484_v12  ;;  %v648_v48 = vadd.f32 %v647_v46, %v2484_v12  ;;  %v720_v49 = vpop.f32.mrb[5].mxu1  ;;  %v649_v50 = vpop.f32.mrb[6].mxu0  ;;  %832 = vmatprep.subr.bf16.mxu0 %v780_v41 }
 0x13f   : > { %v721_v51 = vadd.f32 %v720_v49, %v2484_v12  ;;  %v650_v52 = vadd.f32 %v649_v50, %v2496_v39  ;;  %v722_v53 = vpop.f32.mrb[6].mxu1  ;;  %885 = vmatprep.subr.bf16.mxu1 %v782_v43  ;;  %v651_v54 = vpop.f32.mrb[7].mxu0  ;;  %833 = vmatpush1.bf16.msra.mxu0 %v779_v37  ;;  %v755_v58 = vmax.f32 %v646_v44, 0.0 }
 0x140   : > { %v723_v55 = vadd.f32 %v722_v53, %v2496_v39  ;;  %v652_v56 = vadd.f32 %v651_v54, %v2496_v39  ;;  %v724_v57 = vpop.f32.mrb[7].mxu1  ;;  %886 = vmatpush1.bf16.msra.mxu1 %v781_v40  ;;  %v757_v61 = vmax.f32 %v719_v47, 0.0  ;;  %v756_v62 = vmax.f32 %v648_v48, 0.0  ;;  %v2518_v40 = vpop.permute.xlu0 %464 }
 0x141   : > { %v759_v59 = vmax.f32 %v650_v52, 0.0  ;;  %v725_v60 = vadd.f32 %v724_v57, %v2496_v39  ;;  %v758_v4 = vmax.f32 %v721_v51, 0.0  ;;  %v2520_v44 = vpop.permute.xlu1 %469 }
 0x142   : > { %v761_v63 = vmax.f32 %v723_v55, 0.0  ;;  %v760_v0 = vmax.f32 %v652_v56, 0.0 }
 0x143   : > { %v783_v5 = vpack.c.bf16 %v759_v59, %v755_v58  ;;  %v762_v6 = vmax.f32 %v725_v60, 0.0 }
 0x144   : > { %v785_v14 = vpack.c.bf16 %v761_v63, %v757_v61  ;;  %v784_v15 = vpack.c.bf16 %v760_v0, %v756_v62  ;;  %v655_v16 = vpop.f32.mrb[8].mxu0 }
 0x145   : > { %v786_v17 = vpack.c.bf16 %v762_v6, %v758_v4  ;;  %v656_v18 = vadd.f32 %v655_v16, %v2506_v3  ;;  %v728_v19 = vpop.f32.mrb[8].mxu1  ;;  %v657_v20 = vpop.f32.mrb[9].mxu0  ;;  %v1838_v6 = vld [vmem:[%s2297_s25 + $0x288] sm:$0xff] }
 0x146   : > { %v729_v21 = vadd.f32 %v728_v19, %v2506_v3  ;;  %v658_v22 = vadd.f32 %v657_v20, %v2506_v3  ;;  %v730_v23 = vpop.f32.mrb[9].mxu1  ;;  %v659_v24 = vpop.f32.mrb[10].mxu0  ;;  %834 = vmatprep.subr.bf16.mxu0 %v784_v15  ;;  %v1870_v19 = vld [vmem:[%s2297_s25 + $0x388] sm:$0xff] }
 0x147   : > { %v731_v25 = vadd.f32 %v730_v23, %v2506_v3  ;;  %v660_v26 = vadd.f32 %v659_v24, %v2508_v7  ;;  %v732_v27 = vpop.f32.mrb[10].mxu1  ;;  %887 = vmatprep.subr.bf16.mxu1 %v786_v17  ;;  %v661_v28 = vpop.f32.mrb[11].mxu0  ;;  %835 = vmatpush1.bf16.msra.mxu0 %v783_v5  ;;  %v763_v32 = vmax.f32 %v656_v18, 0.0  ;;  %v1837_v5 = vld [vmem:[%s2297_s25 + $0x280] sm:$0xff] }
 0x148   : > { %v733_v29 = vadd.f32 %v732_v27, %v2508_v7  ;;  %v662_v30 = vadd.f32 %v661_v28, %v2508_v7  ;;  %v734_v31 = vpop.f32.mrb[11].mxu1  ;;  %888 = vmatpush1.bf16.msra.mxu1 %v785_v14  ;;  %v765_v35 = vmax.f32 %v729_v21, 0.0  ;;  %v764_v36 = vmax.f32 %v658_v22, 0.0  ;;  %v1869_v18 = vld [vmem:[%s2297_s25 + $0x380] sm:$0xff] }
 0x149   : > { %v767_v33 = vmax.f32 %v660_v26, 0.0  ;;  %v735_v34 = vadd.f32 %v734_v31, %v2508_v7  ;;  %v766_v41 = vmax.f32 %v731_v25, 0.0  ;;  %v1170_v25 = vpack.c.bf16 %v1838_v6, %v1837_v5  ;;  %v2537_v28 = vld [vmem:[%s2897_s3] sm:$0xff]   ;;  %v1843_v6 = vld [vmem:[%s2297_s25 + $0x2b0] sm:$0xff] }
 0x14a   : > { %v769_v37 = vmax.f32 %v733_v29, 0.0  ;;  %v768_v38 = vmax.f32 %v662_v30, 0.0  ;;  %v1186_v27 = vpack.c.bf16 %v1870_v19, %v1869_v18  ;;  %v1821_v29 = vld [vmem:[%s2297_s25 + $0x200] sm:$0xff]  ;;  %v1822_v30 = vld [vmem:[%s2297_s25 + $0x208] sm:$0xff] }
 0x14b   : > { %v787_v42 = vpack.c.bf16 %v767_v33, %v763_v32  ;;  %v770_v43 = vmax.f32 %v735_v34, 0.0  ;;  %v1853_v31 = vld [vmem:[%s2297_s25 + $0x300] sm:$0xff]  ;;  %v1854_v32 = vld [vmem:[%s2297_s25 + $0x308] sm:$0xff]  ;;  %v1162_v33 = vpack.c.bf16 %v1822_v30, %v1821_v29 }
 0x14c   : > { %v789_v45 = vpack.c.bf16 %v769_v37, %v765_v35  ;;  %v788_v46 = vpack.c.bf16 %v768_v38, %v764_v36  ;;  %v665_v47 = vpop.f32.mrb[12].mxu0  ;;  %v1178_v34 = vpack.c.bf16 %v1854_v32, %v1853_v31  ;;  %v1839_v35 = vld [vmem:[%s2297_s25 + $0x290] sm:$0xff]  ;;  %v1840_v36 = vld [vmem:[%s2297_s25 + $0x298] sm:$0xff]  ;;  %v1846_v29 = vld [vmem:[%s2297_s25 + $0x2c8] sm:$0xff] }
 0x14d   : > { %v790_v48 = vpack.c.bf16 %v770_v43, %v766_v41  ;;  %v666_v49 = vadd.f32 %v665_v47, %v2518_v40  ;;  %v738_v50 = vpop.f32.mrb[12].mxu1  ;;  %v667_v51 = vpop.f32.mrb[13].mxu0  ;;  %v1871_v37 = vld [vmem:[%s2297_s25 + $0x390] sm:$0xff]  ;;  %v1872_v38 = vld [vmem:[%s2297_s25 + $0x398] sm:$0xff]  ;;  %v1195_v41 = vsel %vm492_vm0, %v1162_v33, 0  ;;  %v1877_v30 = vld [vmem:[%s2297_s25 + $0x3c0] sm:$0xff] }
 0x14e   : > { %v739_v52 = vadd.f32 %v738_v50, %v2518_v40  ;;  %v668_v53 = vadd.f32 %v667_v51, %v2518_v40  ;;  %v740_v54 = vpop.f32.mrb[13].mxu1  ;;  %v669_v55 = vpop.f32.mrb[14].mxu0  ;;  %836 = vmatprep.subr.bf16.mxu0 %v788_v46  ;;  %v1243_v43 = vsel %vm492_vm0, %v1178_v34, 0  ;;  %v1187_v46 = vpack.c.bf16 %v1872_v38, %v1871_v37  ;;  %v1823_v47 = vld [vmem:[%s2297_s25 + $0x210] sm:$0xff]  ;;  %v1856_v50 = vld [vmem:[%s2297_s25 + $0x318] sm:$0xff]  ;;  %v1878_v31 = vld [vmem:[%s2297_s25 + $0x3c8] sm:$0xff] }
 0x14f   : > { %v741_v56 = vadd.f32 %v740_v54, %v2518_v40  ;;  %v670_v57 = vadd.f32 %v669_v55, %v2520_v44  ;;  %v742_v58 = vpop.f32.mrb[14].mxu1  ;;  %889 = vmatprep.subr.bf16.mxu1 %v790_v48  ;;  %v671_v59 = vpop.f32.mrb[15].mxu0  ;;  %837 = vmatpush1.bf16.msra.mxu0 %v787_v42  ;;  %v771_v63 = vmax.f32 %v666_v49, 0.0  ;;  %v1171_v42 = vpack.c.bf16 %v1840_v36, %v1839_v35  ;;  %v1824_v48 = vld [vmem:[%s2297_s25 + $0x218] sm:$0xff]  ;;  %v1855_v49 = vld [vmem:[%s2297_s25 + $0x310] sm:$0xff]  ;;  %v1842_v54 = vld [vmem:[%s2297_s25 + $0x2a8] sm:$0xff] }
 0x150   : > { %v743_v60 = vadd.f32 %v742_v58, %v2520_v44  ;;  %v672_v61 = vadd.f32 %v671_v59, %v2520_v44  ;;  %v744_v62 = vpop.f32.mrb[15].mxu1  ;;  %890 = vmatpush1.bf16.msra.mxu1 %v789_v45  ;;  %v773_v14 = vmax.f32 %v739_v52, 0.0  ;;  %v772_v15 = vmax.f32 %v668_v53, 0.0  ;;  %v2560_v45 = vld [vmem:[%s2897_s3 + $0x8] sm:$0xff]   ;;  %v1841_v53 = vld [vmem:[%s2297_s25 + $0x2a0] sm:$0xff] }
 0x151   : > { %v775_v0 = vmax.f32 %v670_v57, 0.0  ;;  %v745_v4 = vadd.f32 %v744_v62, %v2520_v44  ;;  %v774_v20 = vmax.f32 %v741_v56, 0.0  ;;  %v1163_v51 = vpack.c.bf16 %v1824_v48, %v1823_v47  ;;  %v1873_v55 = vld [vmem:[%s2297_s25 + $0x3a0] sm:$0xff]  ;;  %v1874_v56 = vld [vmem:[%s2297_s25 + $0x3a8] sm:$0xff]  ;;  %v1848_v47 = vld [vmem:[%s2297_s25 + $0x2d8] sm:$0xff] }
 0x152   : > { %v777_v16 = vmax.f32 %v743_v60, 0.0  ;;  %v776_v17 = vmax.f32 %v672_v61, 0.0  ;;  %v1179_v52 = vpack.c.bf16 %v1856_v50, %v1855_v49  ;;  %v1172_v58 = vpack.c.bf16 %v1842_v54, %v1841_v53  ;;  %v1825_v61 = vld [vmem:[%s2297_s25 + $0x220] sm:$0xff]  ;;  %v1826_v62 = vld [vmem:[%s2297_s25 + $0x228] sm:$0xff]  ;;  %v1879_v48 = vld [vmem:[%s2297_s25 + $0x3d0] sm:$0xff] }
 0x153   : > { %v791_v21 = vpack.c.bf16 %v775_v0, %v771_v63  ;;  %v778_v22 = vmax.f32 %v745_v4, 0.0  ;;  %v1198_v57 = vsel %vm492_vm0, %v1163_v51, 0  ;;  %v1188_v60 = vpack.c.bf16 %v1874_v56, %v1873_v55  ;;  %v1857_v63 = vld [vmem:[%s2297_s25 + $0x320] sm:$0xff]  ;;  %v1858_v0 = vld [vmem:[%s2297_s25 + $0x328] sm:$0xff]  ;;  %v1880_v49 = vld [vmem:[%s2297_s25 + $0x3d8] sm:$0xff] }
 0x154   : > { %v793_v23 = vpack.c.bf16 %v777_v16, %v773_v14  ;;  %v792_v24 = vpack.c.bf16 %v776_v17, %v772_v15  ;;  %v1246_v59 = vsel %vm492_vm0, %v1179_v52, 0  ;;  %v1164_v4 = vpack.c.bf16 %v1826_v62, %v1825_v61  ;;  %v1844_v14 = vld [vmem:[%s2297_s25 + $0x2b8] sm:$0xff]  ;;  %v1875_v15 = vld [vmem:[%s2297_s25 + $0x3b0] sm:$0xff]  ;;  %v1829_v36 = vld [vmem:[%s2297_s25 + $0x240] sm:$0xff] }
 0x155   : > { %v794_v26 = vpack.c.bf16 %v778_v22, %v774_v20  ;;  %v1180_v5 = vpack.c.bf16 %v1858_v0, %v1857_v63  ;;  %v1876_v16 = vld [vmem:[%s2297_s25 + $0x3b8] sm:$0xff]  ;;  %v1173_v18 = vpack.c.bf16 %v1844_v14, %v1843_v6  ;;  %v1190_v35 = vpack.c.bf16 %v1878_v31, %v1877_v30  ;;  %v1830_v37 = vld [vmem:[%s2297_s25 + $0x248] sm:$0xff]  ;;  %v1861_v38 = vld [vmem:[%s2297_s25 + $0x340] sm:$0xff] }
 0x156   : > { %838 = vmatprep.subr.bf16.mxu0 %v792_v24  ;;  %v1201_v17 = vsel %vm492_vm0, %v1164_v4, 0  ;;  %v1189_v20 = vpack.c.bf16 %v1876_v16, %v1875_v15  ;;  %v1828_v22 = vld [vmem:[%s2297_s25 + $0x238] sm:$0xff]  ;;  %v1191_v53 = vpack.c.bf16 %v1880_v49, %v1879_v48  ;;  %v1831_v54 = vld [vmem:[%s2297_s25 + $0x250] sm:$0xff]  ;;  %v1850_v61 = vld [vmem:[%s2297_s25 + $0x2e8] sm:$0xff] }
 0x157   : > { %891 = vmatprep.subr.bf16.mxu1 %v794_v26  ;;  %839 = vmatpush1.bf16.msra.mxu0 %v791_v21  ;;  %v1249_v19 = vsel %vm492_vm0, %v1180_v5, 0  ;;  %v1827_v21 = vld [vmem:[%s2297_s25 + $0x230] sm:$0xff]  ;;  %v1860_v24 = vld [vmem:[%s2297_s25 + $0x338] sm:$0xff]  ;;  %v1881_v62 = vld [vmem:[%s2297_s25 + $0x3e0] sm:$0xff] }
 0x158   : > { %892 = vmatpush1.bf16.msra.mxu1 %v793_v23  ;;  %2018 = vmatprep.subr.msk.bf16.mxu0 %vm492_vm0, %v1170_v25  ;;  %v1859_v23 = vld [vmem:[%s2297_s25 + $0x330] sm:$0xff]  ;;  %v1165_v25 = vpack.c.bf16 %v1828_v22, %v1827_v21  ;;  %v1832_v55 = vld [vmem:[%s2297_s25 + $0x258] sm:$0xff]  ;;  %v1882_v63 = vld [vmem:[%s2297_s25 + $0x3e8] sm:$0xff] }
 0x159   : > { %2026 = vmatprep.subr.msk.bf16.mxu1 %vm492_vm0, %v1186_v27  ;;  %v1181_v26 = vpack.c.bf16 %v1860_v24, %v1859_v23  ;;  %v1845_v27 = vld [vmem:[%s2297_s25 + $0x2c0] sm:$0xff]  ;;  %v1863_v56 = vld [vmem:[%s2297_s25 + $0x350] sm:$0xff]  ;;  %v1192_v6 = vpack.c.bf16 %v1882_v63, %v1881_v62  ;;  %v1834_v15 = vld [vmem:[%s2297_s25 + $0x268] sm:$0xff] }
 0x15a   : > { %1817 = vmatmul.mubr.msk.bf16.vlgmr.msra.gmra.mrb[16].mxu0 %vm825_vm1, %v2537_v28  ;;  %v1204_v32 = vsel %vm492_vm0, %v1165_v25, 0  ;;  %v1174_v33 = vpack.c.bf16 %v1846_v29, %v1845_v27  ;;  %v1833_v14 = vld [vmem:[%s2297_s25 + $0x260] sm:$0xff]  ;;  %v1852_v21 = vld [vmem:[%s2297_s25 + $0x2f8] sm:$0xff]  ;;  %v1883_v22 = vld [vmem:[%s2297_s25 + $0x3f0] sm:$0xff] }
 0x15b   : > { %1819 = vmatmul.mubr.msk.bf16.vlgmr.msra.gmra.mrb[16].mxu1 %vm825_vm1, %v2537_v28  ;;  %874 = vmatprep.mubr.bf16.mxu0 %v2178_v2  ;;  %v1252_v34 = vsel %vm492_vm0, %v1181_v26, 0  ;;  %v1865_v16 = vld [vmem:[%s2297_s25 + $0x360] sm:$0xff]  ;;  %v1884_v23 = vld [vmem:[%s2297_s25 + $0x3f8] sm:$0xff]  ;;  %v1835_v29 = vld [vmem:[%s2297_s25 + $0x270] sm:$0xff] }
 0x15c   : > { %927 = vmatprep.mubr.bf16.mxu1 %v2178_v2  ;;  %v1193_v27 = vpack.c.bf16 %v1884_v23, %v1883_v22  ;;  %v1836_v30 = vld [vmem:[%s2297_s25 + $0x278] sm:$0xff]  ;;  %v1867_v31 = vld [vmem:[%s2297_s25 + $0x370] sm:$0xff] }
 0x160   : > { %1955 = vmatpush3.bf16.xpose.msra.mxu0 %v1195_v41  ;;  %v1862_v41 = vld [vmem:[%s2297_s25 + $0x348] sm:$0xff] }
 0x161   : > { %1979 = vmatpush3.bf16.xpose.msra.mxu1 %v1243_v43  ;;  %2019 = vmatprep.subr.msk.bf16.mxu0 %vm492_vm0, %v1171_v42  ;;  %v1166_v42 = vpack.c.bf16 %v1830_v37, %v1829_v36  ;;  %v1182_v43 = vpack.c.bf16 %v1862_v41, %v1861_v38 }
 0x162   : > { %1818 = vmatmul.mubr.msk.bf16.gmra.mrb[20].mxu0 %vm825_vm1, %v2560_v45  ;;  %2027 = vmatprep.subr.msk.bf16.mxu1 %vm492_vm0, %v1187_v46  ;;  %v1847_v46 = vld [vmem:[%s2297_s25 + $0x2d0] sm:$0xff] }
 0x163   : > { %1820 = vmatmul.mubr.msk.bf16.gmra.mrb[20].mxu1 %vm825_vm1, %v2560_v45  ;;  %1970 = vmatprep.mubr.msk.bf16.mxu0 %vm492_vm0, %v2279_v1  ;;  %v1207_v50 = vsel %vm492_vm0, %v1166_v42, 0  ;;  %v1175_v51 = vpack.c.bf16 %v1848_v47, %v1847_v46  ;;  %v1255_v52 = vsel %vm492_vm0, %v1182_v43, 0 }
 0x164   : > { %1994 = vmatprep.mubr.msk.bf16.mxu1 %vm492_vm0, %v2279_v1 }
 0x168   : > { %1957 = vmatpush3.bf16.xpose.msra.mxu0 %v1198_v57  ;;  %v1864_v57 = vld [vmem:[%s2297_s25 + $0x358] sm:$0xff] }
 0x169   : > { %1981 = vmatpush3.bf16.xpose.msra.mxu1 %v1246_v59  ;;  %2020 = vmatprep.subr.msk.bf16.mxu0 %vm492_vm0, %v1172_v58  ;;  %v1167_v58 = vpack.c.bf16 %v1832_v55, %v1831_v54  ;;  %v1183_v59 = vpack.c.bf16 %v1864_v57, %v1863_v56 }
 0x16a   : > { %2028 = vmatprep.subr.msk.bf16.mxu1 %vm492_vm0, %v1188_v60  ;;  %v1849_v60 = vld [vmem:[%s2297_s25 + $0x2e0] sm:$0xff] }
 0x16b   : > { %v1210_v0 = vsel %vm492_vm0, %v1167_v58, 0  ;;  %v1176_v4 = vpack.c.bf16 %v1850_v61, %v1849_v60  ;;  %v1258_v5 = vsel %vm492_vm0, %v1183_v59, 0 }
 0x170   : > { %1959 = vmatpush3.bf16.xpose.msra.mxu0 %v1201_v17  ;;  %v1866_v17 = vld [vmem:[%s2297_s25 + $0x368] sm:$0xff] }
 0x171   : > { %1983 = vmatpush3.bf16.xpose.msra.mxu1 %v1249_v19  ;;  %2021 = vmatprep.subr.msk.bf16.mxu0 %vm492_vm0, %v1173_v18  ;;  %v1168_v18 = vpack.c.bf16 %v1834_v15, %v1833_v14  ;;  %v1184_v19 = vpack.c.bf16 %v1866_v17, %v1865_v16 }
 0x172   : > { %2029 = vmatprep.subr.msk.bf16.mxu1 %vm492_vm0, %v1189_v20  ;;  %v1851_v20 = vld [vmem:[%s2297_s25 + $0x2f0] sm:$0xff] }
 0x173   : > { %v1213_v24 = vsel %vm492_vm0, %v1168_v18, 0  ;;  %v1177_v25 = vpack.c.bf16 %v1852_v21, %v1851_v20  ;;  %v1261_v26 = vsel %vm492_vm0, %v1184_v19, 0 }
 0x178   : > { %1961 = vmatpush3.bf16.xpose.msra.mxu0 %v1204_v32  ;;  %v1868_v32 = vld [vmem:[%s2297_s25 + $0x378] sm:$0xff]  ;;  %s284_s25 = sand.u32 1, %s2168_s27  }
 0x179   : > { %1985 = vmatpush3.bf16.xpose.msra.mxu1 %v1252_v34  ;;  %2022 = vmatprep.subr.msk.bf16.mxu0 %vm492_vm0, %v1174_v33  ;;  %v1169_v33 = vpack.c.bf16 %v1836_v30, %v1835_v29  ;;  %v1185_v34 = vpack.c.bf16 %v1868_v32, %v1867_v31  ;;  %s1800_s24 = sshll.u32 %s284_s25, 3  ;;  %s2839_s9 = scalar_lea.sflag [#allocation4], %s284_s25 }
 0x17a   : > { %2030 = vmatprep.subr.msk.bf16.mxu1 %vm492_vm0, %v1190_v35  ;;  %s2751_s30 = scalar_lea.vmem [#allocation3], %s1800_s24 }
 0x17b   : > { %v1216_v35 = vsel %vm492_vm0, %v1169_v33, 0  ;;  %v1264_v36 = vsel %vm492_vm0, %v1185_v34, 0 }
 0x180   : > { %1963 = vmatpush3.bf16.xpose.msra.mxu0 %v1207_v50 }
 0x181   : > { %1987 = vmatpush3.bf16.xpose.msra.mxu1 %v1255_v52  ;;  %2023 = vmatprep.subr.msk.bf16.mxu0 %vm492_vm0, %v1175_v51 }
 0x182   : > { %2031 = vmatprep.subr.msk.bf16.mxu1 %vm492_vm0, %v1191_v53 }
 0x188   : > { %1965 = vmatpush3.bf16.xpose.msra.mxu0 %v1210_v0 }
 0x189   : > { %1989 = vmatpush3.bf16.xpose.msra.mxu1 %v1258_v5  ;;  %2024 = vmatprep.subr.msk.bf16.mxu0 %vm492_vm0, %v1176_v4 }
 0x18a   : > { %2032 = vmatprep.subr.msk.bf16.mxu1 %vm492_vm0, %v1192_v6 }
 0x190   : > { %1967 = vmatpush3.bf16.xpose.msra.mxu0 %v1213_v24 }
 0x191   : > { %1991 = vmatpush3.bf16.xpose.msra.mxu1 %v1261_v26  ;;  %2025 = vmatprep.subr.msk.bf16.mxu0 %vm492_vm0, %v1177_v25 }
 0x192   : > { %2033 = vmatprep.subr.msk.bf16.mxu1 %vm492_vm0, %v1193_v27 }
 0x198   : > { %1969 = vmatpush3.bf16.xpose.msra.mxu0 %v1216_v35 }
 0x199   : > { %1993 = vmatpush3.bf16.xpose.msra.mxu1 %v1264_v36 }
 0x19f   : > { %1971 = vmatmul.mubr.msk.bf16.vlgmr.msra.gmra.mrb[24].mxu0 %vm492_vm0, %v2279_v1 }
 0x1a0   : > { %1995 = vmatmul.mubr.msk.bf16.vlgmr.msra.gmra.mrb[24].mxu1 %vm492_vm0, %v2279_v1  ;;  %1972 = vmatprep.mubr.msk.bf16.mxu0 %vm492_vm0, %v2440_v8  ;;  %v2681_v1 = vpop.permute.xlu0 %797 }
 0x1a1   : > { %1996 = vmatprep.mubr.msk.bf16.mxu1 %vm492_vm0, %v2440_v8 }
 0x1a7   : > { %1973 = vmatmul.mubr.msk.bf16.gmra.mrb[28].mxu0 %vm492_vm0, %v2440_v8 }
 0x1a8   : > { %1997 = vmatmul.mubr.msk.bf16.gmra.mrb[28].mxu1 %vm492_vm0, %v2440_v8  ;;  %1974 = vmatprep.mubr.msk.bf16.mxu0 %vm492_vm0, %v2453_v9  ;;  %v2683_v8 = vpop.permute.xlu1 %802 }
 0x1a9   : > { %1998 = vmatprep.mubr.msk.bf16.mxu1 %vm492_vm0, %v2453_v9 }
 0x1ac   : > { %v2687_v37 = vpop.permute.xlu1 %812 }
 0x1af   : > { %1975 = vmatmul.mubr.msk.bf16.gmra.mrb[32].mxu0 %vm492_vm0, %v2453_v9 }
 0x1b0   : > { %1999 = vmatmul.mubr.msk.bf16.gmra.mrb[32].mxu1 %vm492_vm0, %v2453_v9  ;;  %1976 = vmatprep.mubr.msk.bf16.mxu0 %vm492_vm0, %v2466_v10  ;;  %v2685_v9 = vpop.permute.xlu0 %807  ;;  %v2699_v63 = vpop.permute.xlu1 %961 }
 0x1b1   : > { %2000 = vmatprep.mubr.msk.bf16.mxu1 %vm492_vm0, %v2466_v10 }
 0x1b4   : > { %v2697_v62 = vpop.permute.xlu0 %956 }
 0x1b7   : > { %1977 = vmatmul.mubr.msk.bf16.gmra.mrb[36].mxu0 %vm492_vm0, %v2466_v10 }
 0x1b8   : > { %2001 = vmatmul.mubr.msk.bf16.gmra.mrb[36].mxu1 %vm492_vm0, %v2466_v10  ;;  %1516 = vmatprep.mubr.bf16.mxu0 %v2178_v2 }
 0x1b9   : > { %1569 = vmatprep.mubr.bf16.mxu1 %v2178_v2 }
 0x22d   : > { %v866_v38 = vpop.f32.mrb[16].mxu0 }
 0x22e   : > { %v867_v41 = vadd.f32 %v866_v38, %v2681_v1  ;;  %v919_v42 = vpop.f32.mrb[16].mxu1  ;;  %v868_v43 = vpop.f32.mrb[17].mxu0 }
 0x22f   : > { %v920_v10 = vadd.f32 %v919_v42, %v2681_v1  ;;  %v869_v46 = vadd.f32 %v868_v43, %v2681_v1  ;;  %v921_v47 = vpop.f32.mrb[17].mxu1  ;;  %v870_v48 = vpop.f32.mrb[18].mxu0 }
 0x230   : > { %v938_v49 = vmax.f32 %v867_v41, 0.0  ;;  %v922_v50 = vadd.f32 %v921_v47, %v2681_v1  ;;  %v871_v51 = vadd.f32 %v870_v48, %v2683_v8  ;;  %v923_v52 = vpop.f32.mrb[18].mxu1  ;;  %v872_v53 = vpop.f32.mrb[19].mxu0 }
 0x231   : > { %v940_v54 = vmax.f32 %v920_v10, 0.0  ;;  %v939_v55 = vmax.f32 %v869_v46, 0.0  ;;  %v924_v56 = vadd.f32 %v923_v52, %v2683_v8  ;;  %v873_v57 = vadd.f32 %v872_v53, %v2683_v8  ;;  %v925_v58 = vpop.f32.mrb[19].mxu1  ;;  %v2714_v42 = vpop.permute.xlu0 %966 }
 0x232   : > { %v941_v59 = vmax.f32 %v922_v50, 0.0  ;;  %v942_v60 = vmax.f32 %v871_v51, 0.0  ;;  %v926_v61 = vadd.f32 %v925_v58, %v2683_v8  ;;  %v974_v5 = vmul.f32 %v2697_v62, %v938_v49  ;;  %v2720_v53 = vpop.permute.xlu1 %971 }
 0x233   : > { %v944_v0 = vmax.f32 %v924_v56, 0.0  ;;  %v943_v4 = vmax.f32 %v873_v57, 0.0  ;;  %v976_v15 = vmul.f32 %v2697_v62, %v940_v54  ;;  %v975_v16 = vmul.f32 %v2697_v62, %v939_v55 }
 0x234   : > { %v978_v6 = vmul.f32 %v2699_v63, %v942_v60  ;;  %v945_v14 = vmax.f32 %v926_v61, 0.0  ;;  %v977_v20 = vmul.f32 %v2697_v62, %v941_v59 }
 0x235   : > { %v980_v17 = vmul.f32 %v2699_v63, %v944_v0  ;;  %v979_v18 = vmul.f32 %v2699_v63, %v943_v4  ;;  %v876_v19 = vpop.f32.mrb[20].mxu0 }
 0x236   : > { %v990_v21 = vadd.f32 %v978_v6, %v974_v5  ;;  %v981_v22 = vmul.f32 %v2699_v63, %v945_v14  ;;  %v877_v23 = vadd.f32 %v876_v19, %v2685_v9  ;;  %v929_v24 = vpop.f32.mrb[20].mxu1  ;;  %v878_v25 = vpop.f32.mrb[21].mxu0  ;;  %v1031_v14 = vlaneseq }
 0x237   : > { %v1008_v26 = vadd.f32 %v980_v17, %v976_v15  ;;  %v999_v27 = vadd.f32 %v979_v18, %v975_v16  ;;  %v930_v29 = vadd.f32 %v929_v24, %v2685_v9  ;;  %v879_v30 = vadd.f32 %v878_v25, %v2685_v9  ;;  %v931_v31 = vpop.f32.mrb[21].mxu1  ;;  %v880_v32 = vpop.f32.mrb[22].mxu0 }
 0x238   : > { %v1017_v33 = vadd.f32 %v981_v22, %v977_v20  ;;  %v946_v34 = vmax.f32 %v877_v23, 0.0  ;;  %v932_v35 = vadd.f32 %v931_v31, %v2685_v9  ;;  %v881_v36 = vadd.f32 %v880_v32, %v2687_v37  ;;  %v933_v38 = vpop.f32.mrb[22].mxu1  ;;  %v882_v41 = vpop.f32.mrb[23].mxu0 }
 0x239   : > { %v948_v43 = vmax.f32 %v930_v29, 0.0  ;;  %v947_v10 = vmax.f32 %v879_v30, 0.0  ;;  %v934_v46 = vadd.f32 %v933_v38, %v2687_v37  ;;  %v883_v47 = vadd.f32 %v882_v41, %v2687_v37  ;;  %v935_v48 = vpop.f32.mrb[23].mxu1  ;;  %v1029_v38 = vpop.permute.xlu0 %1028 }
 0x23a   : > { %v982_v49 = vmul.f32 %v2714_v42, %v946_v34  ;;  %v949_v50 = vmax.f32 %v932_v35, 0.0  ;;  %v950_v51 = vmax.f32 %v881_v36, 0.0  ;;  %v936_v52 = vadd.f32 %v935_v48, %v2687_v37 }
 0x23b   : > { %v984_v54 = vmul.f32 %v2714_v42, %v948_v43  ;;  %v983_v55 = vmul.f32 %v2714_v42, %v947_v10  ;;  %v952_v56 = vmax.f32 %v934_v46, 0.0  ;;  %v951_v57 = vmax.f32 %v883_v47, 0.0 }
 0x23c   : > { %v991_v58 = vadd.f32 %v990_v21, %v982_v49  ;;  %v985_v59 = vmul.f32 %v2714_v42, %v949_v50  ;;  %v986_v60 = vmul.f32 %v2720_v53, %v950_v51  ;;  %v953_v61 = vmax.f32 %v936_v52, 0.0 }
 0x23d   : > { %v1009_v0 = vadd.f32 %v1008_v26, %v984_v54  ;;  %v1000_v4 = vadd.f32 %v999_v27, %v983_v55  ;;  %v988_v5 = vmul.f32 %v2720_v53, %v952_v56  ;;  %v987_v6 = vmul.f32 %v2720_v53, %v951_v57 }
 0x23e   : > { %v1018_v15 = vadd.f32 %v1017_v33, %v985_v59  ;;  %v992_v16 = vadd.f32 %v991_v58, %v986_v60  ;;  %v989_v17 = vmul.f32 %v2720_v53, %v953_v61  ;;  %v1032_v24 = vshrl.u32 %v1031_v14, 7 }
 0x23f   : > { %v1010_v18 = vadd.f32 %v1009_v0, %v988_v5  ;;  %v1001_v19 = vadd.f32 %v1000_v4, %v987_v6  ;;  %vm2743_vm2 = vcmp.lt.s32.totalorder %v1031_v14, 512 }
 0x240   : > { %v993_v20 = vrot.slane %v992_v16, 4  ;;  %v1019_v21 = vadd.f32 %v1018_v15, %v989_v17  ;;  %v1033_v33 = vsub.s32 0, %v1032_v24 }
 0x241   : > { %v1011_v22 = vrot.slane %v1010_v18, 4  ;;  %v1002_v23 = vrot.slane %v1001_v19, 4 }
 0x242   : > { %v994_v25 = vadd.f32 %v993_v20, %v992_v16  ;;  %v1020_v26 = vrot.slane %v1019_v21, 4  ;;  %v2730_v49 = vrot.slane %v1029_v38, %v1033_v33 }
 0x243   : > { %v1012_v27 = vadd.f32 %v1011_v22, %v1010_v18  ;;  %v1003_v29 = vadd.f32 %v1002_v23, %v1001_v19 }
 0x244   : > { %v995_v30 = vrot.slane %v994_v25, 2  ;;  %v1021_v31 = vadd.f32 %v1020_v26, %v1019_v21  ;;  %v2179_v26 = vmov 1966171168  }
 0x245   : > { %v1013_v32 = vrot.slane %v1012_v27, 2  ;;  %v1004_v34 = vrot.slane %v1003_v29, 2 }
 0x246   : > { %v996_v35 = vadd.f32 %v995_v30, %v994_v25  ;;  %v1022_v36 = vrot.slane %v1021_v31, 2 }
 0x247   : > { %v1014_v41 = vadd.f32 %v1013_v32, %v1012_v27  ;;  %v1005_v43 = vadd.f32 %v1004_v34, %v1003_v29  ;;  %v1070_v27 = vunpack.c.l.s4 %v2179_v26 }
 0x248   : > { %v997_v10 = vrot.slane %v996_v35, 1  ;;  %v1023_v46 = vadd.f32 %v1022_v36, %v1021_v31 }
 0x249   : > { %v1015_v47 = vrot.slane %v1014_v41, 1  ;;  %v1006_v48 = vrot.slane %v1005_v43, 1  ;;  %v1071_v29 = vunpack.c.0.s8 %v1070_v27 }
 0x24a   : > { %v998_v50 = vadd.f32 %v997_v10, %v996_v35  ;;  %v1024_v51 = vrot.slane %v1023_v46, 1 }
 0x24b   : > { %v1016_v52 = vadd.f32 %v1015_v47, %v1014_v41  ;;  %v1007_v54 = vadd.f32 %v1006_v48, %v1005_v43  ;;  %v2736_v32 = vsub.s32 %v1071_v29, %v1032_v24 }
 0x24c   : > { %v1035_v55 = vadd.f32 %v2730_v49, %v998_v50  ;;  %v1025_v56 = vadd.f32 %v1024_v51, %v1023_v46 }
 0x24d   : > { %v1037_v57 = vadd.f32 %v2730_v49, %v1016_v52  ;;  %v1036_v58 = vadd.f32 %v2730_v49, %v1007_v54 }
 0x24e   : > { %v1039_v59 = vsub.f32 0.0, %v1035_v55  ;;  %v1038_v60 = vadd.f32 %v2730_v49, %v1025_v56 }
 0x24f   : > { %v1041_v61 = vsub.f32 0.0, %v1037_v57  ;;  %v1040_v0 = vsub.f32 0.0, %v1036_v58 }
 0x250   : > { %v1043_v4 = vmul.f32 1.442695, %v1039_v59  ;;  %v1042_v5 = vsub.f32 0.0, %v1038_v60 }
 0x251   : > { %v1047_v6 = vmul.f32 1.442695, %v1041_v61  ;;  %v1045_v15 = vmul.f32 1.442695, %v1040_v0 }
 0x252   : > { %2082 = vpow2.f32 %v1043_v4  ;;  %v1049_v16 = vmul.f32 1.442695, %v1042_v5 }
 0x253   : > { %2084 = vpow2.f32 %v1047_v6 }
 0x254   : > { %2086 = vpow2.f32 %v1045_v15 }
 0x255   : > { %2088 = vpow2.f32 %v1049_v16 }
 0x25c   : > { %v2083_v17 = vpop.eup %2082 }
 0x25d   : > { %v2085_v18 = vpop.eup %2084  ;;  %v1051_v19 = vadd.f32 1.0, %v2083_v17 }
 0x25e   : > { %v2087_v20 = vpop.eup %2086  ;;  %v1053_v21 = vadd.f32 1.0, %v2085_v18 }
 0x25f   : > { %v2089_v22 = vpop.eup %2088  ;;  %2090 = vrcp.f32 %v1051_v19  ;;  %v1052_v23 = vadd.f32 1.0, %v2087_v20 }
 0x260   : > { %2092 = vrcp.f32 %v1053_v21  ;;  %v1054_v25 = vadd.f32 1.0, %v2089_v22 }
 0x261   : > { %2094 = vrcp.f32 %v1052_v23 }
 0x262   : > { %2096 = vrcp.f32 %v1054_v25 }
 0x269   : > { %v2091_v30 = vpop.eup %2090 }
 0x26a   : > { %v2093_v31 = vpop.eup %2092 }
 0x26b   : > { %v2095_v34 = vpop.eup %2094 }
 0x26c   : > { %v2097_v33 = vpop.eup %2096  ;;  %v1067_v35 = vcombine.low %v2091_v30, %v2095_v34 }
 0x26d   : > { %v1068_v36 = vcombine.low %v2093_v31, %v2097_v33 }
 0x26e   : > { %v1075_v38 = vrot.slane %v1067_v35, %v2736_v32 }
 0x26f   : > { %v1082_v41 = vrot.slane %v1068_v36, %v2736_v32 }
 0x271   : > { %v1083_v43 = vcombine.low %v1075_v38, %v1082_v41 }
 0x272   : > { %v1324_v46 = vpop.f32.mrb[24].mxu0 }
 0x273   : > { %v1090_v24 = vrot.slane %v1083_v43, %v2736_v32  ;;  %v1325_v47 = vadd.f32 %v1324_v46, %v2482_v11  ;;  %v1397_v48 = vpop.f32.mrb[24].mxu1  ;;  %v1326_v50 = vpop.f32.mrb[25].mxu0 }
 0x274   : > { %v1398_v51 = vadd.f32 %v1397_v48, %v2482_v11  ;;  %v1327_v52 = vadd.f32 %v1326_v50, %v2482_v11  ;;  %v1399_v54 = vpop.f32.mrb[25].mxu1  ;;  %v1328_v55 = vpop.f32.mrb[26].mxu0 }
 0x275   : > { %1096 = vst.msk [vmem:[%s2751_s30] sm:$0xf] %vm2743_vm2, %v1090_v24  ;;  %v1400_v14 = vadd.f32 %v1399_v54, %v2482_v11  ;;  %v1329_v56 = vadd.f32 %v1328_v55, %v2486_v13  ;;  %v1401_v57 = vpop.f32.mrb[26].mxu1  ;;  %v1330_v58 = vpop.f32.mrb[27].mxu0  ;;  %v1436_v0 = vmax.f32 %v1325_v47, 0.0 }
 0x276   : > { %v1402_v59 = vadd.f32 %v1401_v57, %v2486_v13  ;;  %v1331_v60 = vadd.f32 %v1330_v58, %v2486_v13  ;;  %v1403_v61 = vpop.f32.mrb[27].mxu1  ;;  %v1438_v6 = vmax.f32 %v1398_v51, 0.0  ;;  %v1437_v15 = vmax.f32 %v1327_v52, 0.0 }
 0x277   : > { %v1440_v4 = vmax.f32 %v1329_v56, 0.0  ;;  %v1404_v5 = vadd.f32 %v1403_v61, %v2486_v13  ;;  %v1439_v18 = vmax.f32 %v1400_v14, 0.0 }
 0x278   : > { %v1442_v16 = vmax.f32 %v1402_v59, 0.0  ;;  %v1441_v17 = vmax.f32 %v1331_v60, 0.0 }
 0x279   : > { %v1468_v19 = vpack.c.bf16 %v1440_v4, %v1436_v0  ;;  %v1443_v11 = vmax.f32 %v1404_v5, 0.0 }
 0x27a   : > { %v1470_v20 = vpack.c.bf16 %v1442_v16, %v1438_v6  ;;  %v1469_v21 = vpack.c.bf16 %v1441_v17, %v1437_v15  ;;  %v1334_v22 = vpop.f32.mrb[28].mxu0 }
 0x27b   : > { %v1471_v23 = vpack.c.bf16 %v1443_v11, %v1439_v18  ;;  %v1335_v25 = vadd.f32 %v1334_v22, %v2484_v12  ;;  %v1407_v26 = vpop.f32.mrb[28].mxu1  ;;  %v1336_v27 = vpop.f32.mrb[29].mxu0 }
 0x27c   : > { %v1408_v29 = vadd.f32 %v1407_v26, %v2484_v12  ;;  %v1337_v30 = vadd.f32 %v1336_v27, %v2484_v12  ;;  %v1409_v13 = vpop.f32.mrb[29].mxu1  ;;  %v1338_v31 = vpop.f32.mrb[30].mxu0  ;;  %1484 = vmatprep.subr.bf16.mxu0 %v1469_v21 }
 0x27d   : > { %v1410_v34 = vadd.f32 %v1409_v13, %v2484_v12  ;;  %v1339_v33 = vadd.f32 %v1338_v31, %v2496_v39  ;;  %v1411_v35 = vpop.f32.mrb[30].mxu1  ;;  %1537 = vmatprep.subr.bf16.mxu1 %v1471_v23  ;;  %v1340_v36 = vpop.f32.mrb[31].mxu0  ;;  %1485 = vmatpush1.bf16.msra.mxu0 %v1468_v19  ;;  %v1444_v46 = vmax.f32 %v1335_v25, 0.0 }
 0x27e   : > { %v1412_v38 = vadd.f32 %v1411_v35, %v2496_v39  ;;  %v1341_v41 = vadd.f32 %v1340_v36, %v2496_v39  ;;  %v1413_v43 = vpop.f32.mrb[31].mxu1  ;;  %1538 = vmatpush1.bf16.msra.mxu1 %v1470_v20  ;;  %v1446_v48 = vmax.f32 %v1408_v29, 0.0  ;;  %v1445_v50 = vmax.f32 %v1337_v30, 0.0 }
 0x27f   : > { %v1448_v24 = vmax.f32 %v1339_v33, 0.0  ;;  %v1414_v47 = vadd.f32 %v1413_v43, %v2496_v39  ;;  %v1447_v52 = vmax.f32 %v1410_v34, 0.0 }
 0x280   : > { %v1450_v51 = vmax.f32 %v1412_v38, 0.0  ;;  %v1449_v12 = vmax.f32 %v1341_v41, 0.0 }
 0x281   : > { %v1472_v54 = vpack.c.bf16 %v1448_v24, %v1444_v46  ;;  %v1451_v55 = vmax.f32 %v1414_v47, 0.0 }
 0x282   : > { %v1474_v14 = vpack.c.bf16 %v1450_v51, %v1446_v48  ;;  %v1473_v56 = vpack.c.bf16 %v1449_v12, %v1445_v50  ;;  %v1344_v57 = vpop.f32.mrb[32].mxu0 }
 0x283   : > { %v1475_v58 = vpack.c.bf16 %v1451_v55, %v1447_v52  ;;  %v1345_v59 = vadd.f32 %v1344_v57, %v2506_v3  ;;  %v1417_v60 = vpop.f32.mrb[32].mxu1  ;;  %v1346_v61 = vpop.f32.mrb[33].mxu0 }
 0x284   : > { %v1418_v0 = vadd.f32 %v1417_v60, %v2506_v3  ;;  %v1347_v4 = vadd.f32 %v1346_v61, %v2506_v3  ;;  %v1419_v39 = vpop.f32.mrb[33].mxu1  ;;  %v1348_v5 = vpop.f32.mrb[34].mxu0  ;;  %1486 = vmatprep.subr.bf16.mxu0 %v1473_v56 }
 0x285   : > { %v1420_v6 = vadd.f32 %v1419_v39, %v2506_v3  ;;  %v1349_v15 = vadd.f32 %v1348_v5, %v2508_v7  ;;  %v1421_v16 = vpop.f32.mrb[34].mxu1  ;;  %1539 = vmatprep.subr.bf16.mxu1 %v1475_v58  ;;  %v1350_v17 = vpop.f32.mrb[35].mxu0  ;;  %1487 = vmatpush1.bf16.msra.mxu0 %v1472_v54  ;;  %v1452_v20 = vmax.f32 %v1345_v59, 0.0 }
 0x286   : > { %v1422_v18 = vadd.f32 %v1421_v16, %v2508_v7  ;;  %v1351_v19 = vadd.f32 %v1350_v17, %v2508_v7  ;;  %v1423_v11 = vpop.f32.mrb[35].mxu1  ;;  %1540 = vmatpush1.bf16.msra.mxu1 %v1474_v14  ;;  %v1454_v23 = vmax.f32 %v1418_v0, 0.0  ;;  %v1453_v25 = vmax.f32 %v1347_v4, 0.0 }
 0x287   : > { %v1456_v21 = vmax.f32 %v1349_v15, 0.0  ;;  %v1424_v22 = vadd.f32 %v1423_v11, %v2508_v7  ;;  %v1455_v27 = vmax.f32 %v1420_v6, 0.0 }
 0x288   : > { %v1458_v26 = vmax.f32 %v1422_v18, 0.0  ;;  %v1457_v3 = vmax.f32 %v1351_v19, 0.0 }
 0x289   : > { %v1476_v29 = vpack.c.bf16 %v1456_v21, %v1452_v20  ;;  %v1459_v30 = vmax.f32 %v1424_v22, 0.0 }
 0x28a   : > { %v1478_v13 = vpack.c.bf16 %v1458_v26, %v1454_v23  ;;  %v1477_v31 = vpack.c.bf16 %v1457_v3, %v1453_v25  ;;  %v1354_v34 = vpop.f32.mrb[36].mxu0 }
 0x28b   : > { %v1479_v33 = vpack.c.bf16 %v1459_v30, %v1455_v27  ;;  %v1355_v35 = vadd.f32 %v1354_v34, %v2518_v40  ;;  %v1427_v36 = vpop.f32.mrb[36].mxu1  ;;  %v1356_v38 = vpop.f32.mrb[37].mxu0 }
 0x28c   : > { %v1428_v41 = vadd.f32 %v1427_v36, %v2518_v40  ;;  %v1357_v43 = vadd.f32 %v1356_v38, %v2518_v40  ;;  %v1429_v7 = vpop.f32.mrb[37].mxu1  ;;  %v1358_v46 = vpop.f32.mrb[38].mxu0  ;;  %1488 = vmatprep.subr.bf16.mxu0 %v1477_v31 }
 0x28d   : > { %v1430_v24 = vadd.f32 %v1429_v7, %v2518_v40  ;;  %v1359_v47 = vadd.f32 %v1358_v46, %v2520_v44  ;;  %v1431_v48 = vpop.f32.mrb[38].mxu1  ;;  %1541 = vmatprep.subr.bf16.mxu1 %v1479_v33  ;;  %v1360_v50 = vpop.f32.mrb[39].mxu0  ;;  %1489 = vmatpush1.bf16.msra.mxu0 %v1476_v29  ;;  %v1460_v54 = vmax.f32 %v1355_v35, 0.0 }
 0x28e   : > { %v1432_v51 = vadd.f32 %v1431_v48, %v2520_v44  ;;  %v1361_v12 = vadd.f32 %v1360_v50, %v2520_v44  ;;  %v1433_v52 = vpop.f32.mrb[39].mxu1  ;;  %1542 = vmatpush1.bf16.msra.mxu1 %v1478_v13  ;;  %v1462_v56 = vmax.f32 %v1428_v41, 0.0  ;;  %v1461_v57 = vmax.f32 %v1357_v43, 0.0 }
 0x28f   : > { %v1464_v55 = vmax.f32 %v1359_v47, 0.0  ;;  %v1434_v14 = vadd.f32 %v1433_v52, %v2520_v44  ;;  %v1463_v59 = vmax.f32 %v1430_v24, 0.0 }
 0x290   : > { %v1466_v58 = vmax.f32 %v1432_v51, 0.0  ;;  %v1465_v40 = vmax.f32 %v1361_v12, 0.0 }
 0x291   : > { %v1480_v60 = vpack.c.bf16 %v1464_v55, %v1460_v54  ;;  %v1467_v61 = vmax.f32 %v1434_v14, 0.0 }
 0x292   : > { %v1482_v0 = vpack.c.bf16 %v1466_v58, %v1462_v56  ;;  %v1481_v4 = vpack.c.bf16 %v1465_v40, %v1461_v57 }
 0x293   : > { %v1483_v39 = vpack.c.bf16 %v1467_v61, %v1463_v59 }
 0x294   : > { %1490 = vmatprep.subr.bf16.mxu0 %v1481_v4 }
 0x295   : > { %1543 = vmatprep.subr.bf16.mxu1 %v1483_v39  ;;  %1491 = vmatpush1.bf16.msra.mxu0 %v1480_v60 }
 0x296   : > { %1544 = vmatpush1.bf16.msra.mxu1 %v1482_v0 }
 0x298   : > { %1893 = vmatmul.mubr.msk.bf16.vlgmr.msra.gmra.mrb[40].mxu0 %vm825_vm1, %v2537_v28 }
 0x299   : > { %1895 = vmatmul.mubr.msk.bf16.vlgmr.msra.gmra.mrb[40].mxu1 %vm825_vm1, %v2537_v28  ;;  %1526 = vmatprep.mubr.bf16.mxu0 %v2178_v2 }
 0x29a   : > { %1579 = vmatprep.mubr.bf16.mxu1 %v2178_v2 }
 0x2a0   : > { %1894 = vmatmul.mubr.msk.bf16.gmra.mrb[44].mxu0 %vm825_vm1, %v2560_v45 }
 0x2a1   : > { %1896 = vmatmul.mubr.msk.bf16.gmra.mrb[44].mxu1 %vm825_vm1, %v2560_v45 }
 0x36b   : > { %v1518_v44 = vpop.f32.mrb[40].mxu0 }
 0x36c   : > { %v1519_v5 = vadd.f32 %v1518_v44, %v2681_v1  ;;  %v1571_v6 = vpop.f32.mrb[40].mxu1  ;;  %v1520_v15 = vpop.f32.mrb[41].mxu0 }
 0x36d   : > { %v1572_v16 = vadd.f32 %v1571_v6, %v2681_v1  ;;  %v1521_v17 = vadd.f32 %v1520_v15, %v2681_v1  ;;  %v1573_v28 = vpop.f32.mrb[41].mxu1  ;;  %v1522_v18 = vpop.f32.mrb[42].mxu0 }
 0x36e   : > { %v1590_v19 = vmax.f32 %v1519_v5, 0.0  ;;  %v1574_v2 = vadd.f32 %v1573_v28, %v2681_v1  ;;  %v1523_v11 = vadd.f32 %v1522_v18, %v2683_v8  ;;  %v1575_v20 = vpop.f32.mrb[42].mxu1  ;;  %v1524_v21 = vpop.f32.mrb[43].mxu0 }
 0x36f   : > { %v1592_v22 = vmax.f32 %v1572_v16, 0.0  ;;  %v1591_v45 = vmax.f32 %v1521_v17, 0.0  ;;  %v1576_v23 = vadd.f32 %v1575_v20, %v2683_v8  ;;  %v1525_v25 = vadd.f32 %v1524_v21, %v2683_v8  ;;  %v1577_v26 = vpop.f32.mrb[43].mxu1 }
 0x370   : > { %v1593_v3 = vmax.f32 %v1574_v2, 0.0  ;;  %v1594_v27 = vmax.f32 %v1523_v11, 0.0  ;;  %v1578_v29 = vadd.f32 %v1577_v26, %v2683_v8  ;;  %v1606_v31 = vmul.f32 %v1590_v19, %v2697_v62 }
 0x371   : > { %v1596_v30 = vmax.f32 %v1576_v23, 0.0  ;;  %v1595_v13 = vmax.f32 %v1525_v25, 0.0  ;;  %v1608_v33 = vmul.f32 %v1592_v22, %v2697_v62  ;;  %v1607_v35 = vmul.f32 %v1591_v45, %v2697_v62 }
 0x372   : > { %v1610_v1 = vmul.f32 %v1594_v27, %v2699_v63  ;;  %v1597_v34 = vmax.f32 %v1578_v29, 0.0  ;;  %v1609_v43 = vmul.f32 %v1593_v3, %v2697_v62 }
 0x373   : > { %v1612_v36 = vmul.f32 %v1596_v30, %v2699_v63  ;;  %v1611_v38 = vmul.f32 %v1595_v13, %v2699_v63  ;;  %v1528_v41 = vpop.f32.mrb[44].mxu0 }
 0x374   : > { %v1622_v7 = vadd.f32 %v1610_v1, %v1606_v31  ;;  %v1613_v8 = vmul.f32 %v1597_v34, %v2699_v63  ;;  %v1529_v46 = vadd.f32 %v1528_v41, %v2685_v9  ;;  %v1581_v24 = vpop.f32.mrb[44].mxu1  ;;  %v1530_v47 = vpop.f32.mrb[45].mxu0 }
 0x375   : > { %v1640_v48 = vadd.f32 %v1612_v36, %v1608_v33  ;;  %v1631_v50 = vadd.f32 %v1611_v38, %v1607_v35  ;;  %v1582_v51 = vadd.f32 %v1581_v24, %v2685_v9  ;;  %v1531_v12 = vadd.f32 %v1530_v47, %v2685_v9  ;;  %v1583_v52 = vpop.f32.mrb[45].mxu1  ;;  %v1532_v54 = vpop.f32.mrb[46].mxu0 }
 0x376   : > { %v1649_v55 = vadd.f32 %v1613_v8, %v1609_v43  ;;  %v1598_v14 = vmax.f32 %v1529_v46, 0.0  ;;  %v1584_v56 = vadd.f32 %v1583_v52, %v2685_v9  ;;  %v1533_v62 = vadd.f32 %v1532_v54, %v2687_v37  ;;  %v1585_v57 = vpop.f32.mrb[46].mxu1  ;;  %v1534_v63 = vpop.f32.mrb[47].mxu0 }
 0x377   : > { %v1600_v58 = vmax.f32 %v1582_v51, 0.0  ;;  %v1599_v40 = vmax.f32 %v1531_v12, 0.0  ;;  %v1586_v59 = vadd.f32 %v1585_v57, %v2687_v37  ;;  %v1535_v60 = vadd.f32 %v1534_v63, %v2687_v37  ;;  %v1587_v61 = vpop.f32.mrb[47].mxu1 }
 0x378   : > { %v1614_v0 = vmul.f32 %v1598_v14, %v2714_v42  ;;  %v1601_v4 = vmax.f32 %v1584_v56, 0.0  ;;  %v1602_v39 = vmax.f32 %v1533_v62, 0.0  ;;  %v1588_v44 = vadd.f32 %v1587_v61, %v2687_v37 }
 0x379   : > { %v1616_v5 = vmul.f32 %v1600_v58, %v2714_v42  ;;  %v1615_v9 = vmul.f32 %v1599_v40, %v2714_v42  ;;  %v1604_v6 = vmax.f32 %v1586_v59, 0.0  ;;  %v1603_v15 = vmax.f32 %v1535_v60, 0.0 }
 0x37a   : > { %v1623_v16 = vadd.f32 %v1622_v7, %v1614_v0  ;;  %v1617_v17 = vmul.f32 %v1601_v4, %v2714_v42  ;;  %v1618_v28 = vmul.f32 %v1602_v39, %v2720_v53  ;;  %v1605_v18 = vmax.f32 %v1588_v44, 0.0 }
 0x37b   : > { %v1641_v19 = vadd.f32 %v1640_v48, %v1616_v5  ;;  %v1632_v2 = vadd.f32 %v1631_v50, %v1615_v9  ;;  %v1620_v11 = vmul.f32 %v1604_v6, %v2720_v53  ;;  %v1619_v20 = vmul.f32 %v1603_v15, %v2720_v53 }
 0x37c   : > { %v1650_v21 = vadd.f32 %v1649_v55, %v1617_v17  ;;  %v1624_v37 = vadd.f32 %v1623_v16, %v1618_v28  ;;  %v1621_v22 = vmul.f32 %v1605_v18, %v2720_v53 }
 0x37d   : > { %v1642_v45 = vadd.f32 %v1641_v19, %v1620_v11  ;;  %v1633_v23 = vadd.f32 %v1632_v2, %v1619_v20 }
 0x37e   : > { %v1625_v25 = vrot.slane %v1624_v37, 4  ;;  %v1651_v26 = vadd.f32 %v1650_v21, %v1621_v22 }
 0x37f   : > { %v1643_v3 = vrot.slane %v1642_v45, 4  ;;  %v1634_v27 = vrot.slane %v1633_v23, 4 }
 0x380   : > { %v1626_v42 = vadd.f32 %v1625_v25, %v1624_v37  ;;  %v1652_v29 = vrot.slane %v1651_v26, 4 }
 0x381   : > { %v1644_v30 = vadd.f32 %v1643_v3, %v1642_v45  ;;  %v1635_v13 = vadd.f32 %v1634_v27, %v1633_v23 }
 0x382   : > { %v1627_v31 = vrot.slane %v1626_v42, 2  ;;  %v1653_v1 = vadd.f32 %v1652_v29, %v1651_v26 }
 0x383   : > { %v1645_v34 = vrot.slane %v1644_v30, 2  ;;  %v1636_v33 = vrot.slane %v1635_v13, 2 }
 0x384   : > { %v1628_v35 = vadd.f32 %v1627_v31, %v1626_v42  ;;  %v1654_v36 = vrot.slane %v1653_v1, 2 }
 0x385   : > { %v1646_v38 = vadd.f32 %v1645_v34, %v1644_v30  ;;  %v1637_v41 = vadd.f32 %v1636_v33, %v1635_v13 }
 0x386   : > { %v1629_v43 = vrot.slane %v1628_v35, 1  ;;  %v1655_v53 = vadd.f32 %v1654_v36, %v1653_v1 }
 0x387   : > { %v1647_v7 = vrot.slane %v1646_v38, 1  ;;  %v1638_v8 = vrot.slane %v1637_v41, 1 }
 0x388   : > { %v1630_v46 = vadd.f32 %v1629_v43, %v1628_v35  ;;  %v1656_v24 = vrot.slane %v1655_v53, 1 }
 0x389   : > { %v1648_v47 = vadd.f32 %v1647_v7, %v1646_v38  ;;  %v1639_v48 = vadd.f32 %v1638_v8, %v1637_v41 }
 0x38a   : > { %v1658_v50 = vadd.f32 %v1630_v46, %v2730_v49  ;;  %v1657_v51 = vadd.f32 %v1656_v24, %v1655_v53 }
 0x38b   : > { %v1660_v12 = vadd.f32 %v1648_v47, %v2730_v49  ;;  %v1659_v52 = vadd.f32 %v1639_v48, %v2730_v49 }
 0x38c   : > { %v1662_v54 = vsub.f32 0.0, %v1658_v50  ;;  %v1661_v55 = vadd.f32 %v1657_v51, %v2730_v49 }
 0x38d   : > { %v1664_v14 = vsub.f32 0.0, %v1660_v12  ;;  %v1663_v56 = vsub.f32 0.0, %v1659_v52 }
 0x38e   : > { %v1666_v62 = vmul.f32 1.442695, %v1662_v54  ;;  %v1665_v57 = vsub.f32 0.0, %v1661_v55 }
 0x38f   : > { %v1670_v63 = vmul.f32 1.442695, %v1664_v14  ;;  %v1668_v58 = vmul.f32 1.442695, %v1663_v56 }
 0x390   : > { %2098 = vpow2.f32 %v1666_v62  ;;  %v1672_v40 = vmul.f32 1.442695, %v1665_v57 }
 0x391   : > { %2100 = vpow2.f32 %v1670_v63 }
 0x392   : > { %2102 = vpow2.f32 %v1668_v58 }
 0x393   : > { %2104 = vpow2.f32 %v1672_v40 }
 0x39a   : > { %v2099_v59 = vpop.eup %2098 }
 0x39b   : > { %v2101_v60 = vpop.eup %2100  ;;  %v1674_v61 = vadd.f32 1.0, %v2099_v59 }
 0x39c   : > { %v2103_v0 = vpop.eup %2102  ;;  %v1676_v4 = vadd.f32 1.0, %v2101_v60 }
 0x39d   : > { %v2105_v39 = vpop.eup %2104  ;;  %2106 = vrcp.f32 %v1674_v61  ;;  %v1675_v49 = vadd.f32 1.0, %v2103_v0 }
 0x39e   : > { %2108 = vrcp.f32 %v1676_v4  ;;  %v1677_v44 = vadd.f32 1.0, %v2105_v39 }
 0x39f   : > { %2110 = vrcp.f32 %v1675_v49 }
 0x3a0   : > { %2112 = vrcp.f32 %v1677_v44 }
 0x3a7   : > { %v2107_v5 = vpop.eup %2106 }
 0x3a8   : > { %v2109_v9 = vpop.eup %2108 }
 0x3a9   : > { %v2111_v6 = vpop.eup %2110 }
 0x3aa   : > { %v2113_v15 = vpop.eup %2112  ;;  %v1690_v16 = vcombine.low %v2107_v5, %v2111_v6 }
 0x3ab   : > { %v1691_v17 = vcombine.low %v2109_v9, %v2113_v15 }
 0x3ac   : > { %v1698_v28 = vrot.slane %v1690_v16, %v2736_v32 }
 0x3ad   : > { %v1705_v18 = vrot.slane %v1691_v17, %v2736_v32  ;;  %1724 = sbr.rel (!%p2262_p5) target bundleno = 975 (0x3cf), region = 52 }
 0x3af   : > { %v1706_v19 = vcombine.low %v1698_v28, %v1705_v18 }
 0x3b1   : > { %v1713_v2 = vrot.slane %v1706_v19, %v2736_v32 }
 0x3b3   : > { %1897 = vst.msk [vmem:[%s2751_s30 + $0x4] sm:$0xf] %vm2743_vm2, %v1713_v2 }
 0x3b4   : > { %s2911_s15 = smov (!%p1727_p11, %s1726_s15), 8 }
 0x3b5   : > { %s2844_s16 = sshll.u32 %s2911_s15, 4 }
 0x3b6   : > { %s1731_s17 = ssub.s32 128, %s2844_s16 }
 0x3b7   : > { %1732 = vsyncadd %s2839_s9, %s1731_s17  ;;  %p1901_p12 = scmp.ne.s32.totalorder %s2844_s16, 0  ;;  %s2853_s19 = scalar_lea.hbm %s2901_s7, %s2273_s14 }
 0x3b8   : > { %s1737_s6 = sshll.u32 %s2751_s30, 4  ;;  %s2180_s21 = smov [#allocation3]   ;;  %s1738_s6 = int_to_ptr.vmem [resolvable:$true] %s1737_s6 }
 0x3b9   : > { %s2114_s20 = scalar_lea.vmem %s1738_s6, %s2844_s16  ;;  %s2118_s22 = sshll.u32 %s2180_s21, 4  ;;  %s2119_s22 = int_to_ptr.vmem [resolvable:$false] %s2118_s22 }
 0x3ba   : > { %p2115_p13 = scmp.ne.s32.totalorder %s1738_s6, %s2114_s20  ;;  %s2120_s23 = scalar_lea.vmem %s2119_s22, 256 }
 0x3bb   : > { %p2121_p2 = scmp.lt.s32.totalorder %s1738_s6, %s2119_s22  ;;  %p2122_p3 = scmp.lt.s32.totalorder %s2120_s23, %s2114_s20 }
 0x3bc   : > { %p2116_p0 = pnand %p2115_p13, %p1901_p12 }
 0x3bd   : > { %p2123_p4 = por %p2122_p3, %p2121_p2 }
 0x3be   : > { %p2117_p1 = pneg %p2116_p0 }
 0x3c0   : > { %p2124_p5 = pnand %p2123_p4, %p2117_p1 }
 0x3c2   : > { %2127 = shalt.err (!%p2124_p5)
}
 0x3c3   : > { %s2128_s14 = scalar_lea.hbm %s2853_s19, %s2844_s16  ;;  %s2132_s30 = scalar_lea.hbm %s2901_s7, 192 }
 0x3c4   : > { %p2129_p7 = scmp.ne.s32.totalorder %s2853_s19, %s2128_s14  ;;  %p2133_p10 = scmp.lt.u32.totalorder %s2853_s19, %s2901_s7 }
 0x3c5   : > { %p2134_p11 = scmp.lt.u32.totalorder %s2132_s30, %s2128_s14  ;;  %p2136_p0 = scmp.lt.u32.totalorder %s2128_s14, %s2853_s19 }
 0x3c6   : > { %p2130_p8 = pnand %p2129_p7, %p1901_p12 }
 0x3c7   : > { %p2135_p13 = por %p2134_p11, %p2133_p10 }
 0x3c8   : > { %p2131_p9 = pneg %p2130_p8 }
 0x3c9   : > { %p2137_p1 = por %p2136_p0, %p2135_p13 }
 0x3cb   : > { %p2138_p2 = pnand %p2137_p1, %p2131_p9 }
 0x3cd   : > { %2141 = shalt.err (!%p2138_p2)
}
 0x3ce   : > { %1740 = dma.vmem_to_hbm [thread:$0]  (%p1901_p12), %s1738_s6, %s2844_s16, %s2853_s19, %s2839_s9  }
 0x3cf PF: > { %p2039_p3 = scmp.ge.s32.totalorder %s2176_s29, 2  ;;  %s1749_s17 = sand.u32 1, %s2164_s26  }
 0x3d0   : > { %s1750_s18 = scalar_lea.sflag [#allocation4], %s1749_s17 }
 0x3d1   : > { %p2036_p4 = pnand %p2039_p3, %p2266_p6 }
 0x3d3   : > { %2159 = dma.done.wait (!%p2036_p4), %s1750_s18, 128  }
 0x3d4   : > { %2161 = vsyncadd (!%p2036_p4), %s1750_s18, 4294967168  ;;  %p19_p5 = scmp.ge.s32.totalorder %s2249_s8, 4   ;;  %s2906_s26 = smov %s2168_s27 }
 0x3d5   : > { %s2907_s27 = smov %s2172_s28  ;;  %s2908_s28 = smov %s2260_s11 }
 0x3d6   : > { %s2909_s29 = smov %s2249_s8  ;;  %21 = sbr.rel (!%p19_p5) target bundleno = 6 (0x6), region = 85 }
 0x3dd   :  { %1755 = vsyncpa [#allocation4], 1 }
 0x3de   :  { %1757 = vsyncpa [#allocation4 + $0x1], 1 }

</bundles_post_ra>
